<compile_context>
chip_gen: v7x
topology: tpu7x:2x2x1
jax: 0.10.0
libtpu: 0.0.40
codegen_flags: <defaults>
</compile_context>

<pallas_src>
import functools
import math

import jax
import jax.numpy as jnp
from jax.experimental import pallas as pl
from jax.experimental.pallas import tpu as pltpu


# ----------------------------------------------------------------------------
# Fully fused per-batch forward kernel
# ----------------------------------------------------------------------------
def make_fused_kernel(L, c_emb, d_model, n_head, d_ffn, n_layers, c_out,
                      activation, eps=1e-5):
    D = d_model
    dh = D // n_head
    scale = 1.0 / math.sqrt(dh)

    def _ln(x, g, b):
        mu = jnp.mean(x, axis=-1, keepdims=True)
        var = jnp.mean((x - mu) ** 2, axis=-1, keepdims=True)
        return (x - mu) * jax.lax.rsqrt(var + eps) * g + b

    def _act(x):
        if activation == "relu":
            return jnp.maximum(x, 0.0)
        if activation == "gelu":
            return jax.nn.gelu(x)
        raise ValueError(f"unsupported activation {activation}")

    def kernel(cate_ref, nume_ref, demo_ref, wn_ref,
               win_ref, bin_ref,
               wqkv_ref, wo_ref, w1_ref, w2_ref,
               bqkv_ref, vecd_ref, b1_ref,
               wout_ref, bout_ref,
               o_ref):
        # ---- input encoders: Emb + Conv1d(k=1) + Linear(demo) (pre-projected)
        x_nume = jnp.dot(nume_ref[...], wn_ref[...],
                         preferred_element_type=jnp.float32)          # (L, c_emb)
        h = cate_ref[...] + x_nume + demo_ref[...]                    # (L, c_emb)

        # ---- input projection to d_model ----------------------------------
        x = jnp.dot(h, win_ref[...],
                    preferred_element_type=jnp.float32) + bin_ref[...]  # (L, D)

        # ---- n_layers post-norm encoder layers; activation stays in VMEM --
        for l in range(n_layers):
            vec = vecd_ref[l]          # (6, D): [bo, g1, be1, b2, g2, be2]
            bqkv = bqkv_ref[l]         # (1, 3D)

            # packed QKV projection: one matmul instead of three
            qkv = jnp.dot(x, wqkv_ref[l],
                          preferred_element_type=jnp.float32) + bqkv  # (L, 3D)

            # head-leading (H, L, dh) tensors; batched attention contractions
            qh = jnp.stack(
                [qkv[:, h * dh:(h + 1) * dh] for h in range(n_head)], axis=0)
            kh = jnp.stack(
                [qkv[:, D + h * dh:D + (h + 1) * dh] for h in range(n_head)],
                axis=0)
            vh = jnp.stack(
                [qkv[:, 2 * D + h * dh:2 * D + (h + 1) * dh]
                 for h in range(n_head)], axis=0)

            s = jnp.einsum("hqd,hkd->hqk", qh, kh,
                           preferred_element_type=jnp.float32) * scale  # (H,L,L)
            s = s - jnp.max(s, axis=-1, keepdims=True)
            p = jnp.exp(s)
            p = p * pl.reciprocal(jnp.sum(p, axis=-1, keepdims=True),
                                  approx=True)
            ctx = jnp.einsum("hqk,hkd->hqd", p, vh,
                             preferred_element_type=jnp.float32)        # (H,L,dh)

            attn = jnp.concatenate([ctx[h] for h in range(n_head)], axis=-1)
            attn = jnp.dot(attn, wo_ref[l],
                           preferred_element_type=jnp.float32) + vec[0:1, :]

            x = _ln(x + attn, vec[1:2, :], vec[2:3, :])

            h1 = _act(jnp.dot(x, w1_ref[l],
                              preferred_element_type=jnp.float32) + b1_ref[l])
            h2 = jnp.dot(h1, w2_ref[l],
                         preferred_element_type=jnp.float32) + vec[3:4, :]
            x = _ln(x + h2, vec[4:5, :], vec[5:6, :])

        # ---- output projection folded into the same kernel (single store) -
        o_ref[...] = (jnp.dot(x, wout_ref[...],
                              preferred_element_type=jnp.float32)
                      + bout_ref[...])

    return kernel


# ----------------------------------------------------------------------------
# Full forward pass (wrapper)
# ----------------------------------------------------------------------------
def transformer_forward(cate, nume, demo, params, *, n_head, activation):
    B, L = cate.shape
    c_emb = params["emb"].shape[1]
    d_model = params["w_in"].shape[1]
    d_ffn = params["w1"].shape[-1]
    n_layers = params["wqkv"].shape[0]
    c_out = params["w_out"].shape[1]
    n_nume = nume.shape[1]

    # Cheap glue in XLA: embedding gather, NCL->NLC transpose of nume, and the
    # degenerate (B,4)x(4,c_emb) demo projection hoisted out of the kernel.
    cate_emb = jnp.take(params["emb"], cate, axis=0)                   # (B,L,c_emb)
    nume_t = jnp.transpose(nume, (0, 2, 1)).astype(jnp.float32)        # (B,L,10)
    demo_proj = jnp.dot(demo.astype(jnp.float32),
                        params["w_demo"]).reshape(B, 1, c_emb)         # (B,1,c_emb)

    kernel = make_fused_kernel(L, c_emb, d_model, n_head, d_ffn,
                               n_layers, c_out, activation)

    def const2(shape):
        return pl.BlockSpec(shape, lambda b: (0, 0))

    def const3(shape):
        return pl.BlockSpec(shape, lambda b: (0, 0, 0))

    return pl.pallas_call(
        kernel,
        out_shape=jax.ShapeDtypeStruct((B, L, c_out), jnp.float32),
        grid=(B,),
        in_specs=[
            pl.BlockSpec((None, L, c_emb), lambda b: (b, 0, 0)),   # cate emb
            pl.BlockSpec((None, L, n_nume), lambda b: (b, 0, 0)),  # nume (NLC)
            pl.BlockSpec((None, 1, c_emb), lambda b: (b, 0, 0)),   # demo proj
            const2(params["w_nume"].shape),
            const2(params["w_in"].shape),
            const2(params["b_in"].shape),
            const3(params["wqkv"].shape),
            const3(params["wo"].shape),
            const3(params["w1"].shape),
            const3(params["w2"].shape),
            const3(params["bqkv"].shape),
            const3(params["vecd"].shape),
            const3(params["b1"].shape),
            const2(params["w_out"].shape),
            const2(params["b_out"].shape),
        ],
        out_specs=pl.BlockSpec((None, L, c_out), lambda b: (b, 0, 0)),
        compiler_params=pltpu.CompilerParams(
            dimension_semantics=("parallel",)),
    )(cate_emb, nume_t, demo_proj,
      params["w_nume"], params["w_in"], params["b_in"],
      params["wqkv"], params["wo"], params["w1"], params["w2"],
      params["bqkv"], params["vecd"], params["b1"],
      params["w_out"], params["b_out"])


# ----------------------------------------------------------------------------
# Parameter initialisation (deterministic, synthetic, stacked per-layer)
# ----------------------------------------------------------------------------
def init_params(key, c_emb, c_out, d_model, n_head, d_ffn, n_layers,
                vocab=16, n_nume=10, n_demo=4):
    keys = iter(jax.random.split(key, 16))

    def nrm(shape, std):
        return jax.random.normal(next(keys), shape, jnp.float32) * std

    s_d = 1.0 / math.sqrt(d_model)
    s_f = 1.0 / math.sqrt(d_ffn)

    params = {
        "emb": nrm((vocab, c_emb), 0.02),
        # Conv1d(10, c_emb, 1, bias=False), kaiming_normal fan_out/relu, (in,out)
        "w_nume": nrm((n_nume, c_emb), math.sqrt(2.0 / c_emb)),
        # Linear(4, c_emb, bias=False)
        "w_demo": nrm((n_demo, c_emb), 1.0 / math.sqrt(n_demo)),
        "w_in": nrm((c_emb, d_model), 1.0 / math.sqrt(c_emb)),
        "b_in": jnp.zeros((1, d_model), jnp.float32),
        # stacked per-layer weights
        "wqkv": nrm((n_layers, d_model, 3 * d_model), s_d),
        "bqkv": jnp.zeros((n_layers, 1, 3 * d_model), jnp.float32),
        "wo": nrm((n_layers, d_model, d_model), s_d),
        "w1": nrm((n_layers, d_model, d_ffn), s_d),
        "b1": jnp.zeros((n_layers, 1, d_ffn), jnp.float32),
        "w2": nrm((n_layers, d_ffn, d_model), s_f),
        # packed per-layer (1, D) vectors: rows = [bo, g1, be1, b2, g2, be2]
        "vecd": jnp.tile(
            jnp.array([0.0, 1.0, 0.0, 0.0, 1.0, 0.0],
                      jnp.float32).reshape(1, 6, 1),
            (n_layers, 1, d_model)),
        "w_out": nrm((d_model, c_out), s_d),
        "b_out": jnp.zeros((1, c_out), jnp.float32),
    }
    return params


if __name__ == "__main__":
    B, L = 2, 8
    c_emb, c_out, d_model, n_head, d_ffn, n_layers = 16, 8, 32, 2, 64, 2
    activation = "relu"

    key = jax.random.PRNGKey(0)
    k1, k2, k3, kp = jax.random.split(key, 4)
    cate = jax.random.randint(k1, (B, L), 0, 16, dtype=jnp.int32)
    nume = jax.random.normal(k2, (B, 10, L), jnp.float32)   # PyTorch NCL layout
    demo = jax.random.normal(k3, (B, 4), jnp.float32)

    params = init_params(kp, c_emb, c_out, d_model, n_head, d_ffn, n_layers)

    fwd = jax.jit(functools.partial(transformer_forward,
                                    n_head=n_head, activation=activation))
    out = fwd(cate, nume, demo, params)
    jax.block_until_ready(out)
    assert out.shape == (B, L, c_out)
    assert bool(jnp.all(jnp.isfinite(out)))
    print("KERNEL_OK")
</pallas_src>

<mosaic_0001>
module attributes {stable_mosaic.version = 11 : i64} {
  func.func @kernel(%arg0: i32, %arg1: memref<1x8x16xf32, #tpu.memory_space<vmem>>, %arg2: memref<1x8x10xf32, #tpu.memory_space<vmem>>, %arg3: memref<1x1x16xf32, #tpu.memory_space<vmem>>, %arg4: memref<10x16xf32, #tpu.memory_space<vmem>>, %arg5: memref<16x32xf32, #tpu.memory_space<vmem>>, %arg6: memref<1x32xf32, #tpu.memory_space<vmem>>, %arg7: memref<2x32x96xf32, #tpu.memory_space<vmem>>, %arg8: memref<2x32x32xf32, #tpu.memory_space<vmem>>, %arg9: memref<2x32x64xf32, #tpu.memory_space<vmem>>, %arg10: memref<2x64x32xf32, #tpu.memory_space<vmem>>, %arg11: memref<2x1x96xf32, #tpu.memory_space<vmem>>, %arg12: memref<2x6x32xf32, #tpu.memory_space<vmem>>, %arg13: memref<2x1x64xf32, #tpu.memory_space<vmem>>, %arg14: memref<32x8xf32, #tpu.memory_space<vmem>>, %arg15: memref<1x8xf32, #tpu.memory_space<vmem>>, %arg16: memref<1x8x8xf32, #tpu.memory_space<vmem>>) attributes {dimension_semantics = [#tpu.dimension_semantics<parallel>], iteration_bounds = array<i64: 2>, scalar_prefetch = 0 : i64, scratch_operands = 0 : i64, tpu.core_type = #tpu.core_type<tc>, window_params = [{transform_indices = @transform_0, window_bounds = array<i64: 1, 8, 16>}, {transform_indices = @transform_1, window_bounds = array<i64: 1, 8, 10>}, {transform_indices = @transform_2, window_bounds = array<i64: 1, 1, 16>}, {pipeline_mode = #tpu.pipeline_mode<synchronous>, transform_indices = @transform_3, window_bounds = array<i64: 10, 16>}, {pipeline_mode = #tpu.pipeline_mode<synchronous>, transform_indices = @transform_4, window_bounds = array<i64: 16, 32>}, {pipeline_mode = #tpu.pipeline_mode<synchronous>, transform_indices = @transform_5, window_bounds = array<i64: 1, 32>}, {pipeline_mode = #tpu.pipeline_mode<synchronous>, transform_indices = @transform_6, window_bounds = array<i64: 2, 32, 96>}, {pipeline_mode = #tpu.pipeline_mode<synchronous>, transform_indices = @transform_7, window_bounds = array<i64: 2, 32, 32>}, {pipeline_mode = #tpu.pipeline_mode<synchronous>, transform_indices = @transform_8, window_bounds = array<i64: 2, 32, 64>}, {pipeline_mode = #tpu.pipeline_mode<synchronous>, transform_indices = @transform_9, window_bounds = array<i64: 2, 64, 32>}, {pipeline_mode = #tpu.pipeline_mode<synchronous>, transform_indices = @transform_10, window_bounds = array<i64: 2, 1, 96>}, {pipeline_mode = #tpu.pipeline_mode<synchronous>, transform_indices = @transform_11, window_bounds = array<i64: 2, 6, 32>}, {pipeline_mode = #tpu.pipeline_mode<synchronous>, transform_indices = @transform_12, window_bounds = array<i64: 2, 1, 64>}, {pipeline_mode = #tpu.pipeline_mode<synchronous>, transform_indices = @transform_13, window_bounds = array<i64: 32, 8>}, {pipeline_mode = #tpu.pipeline_mode<synchronous>, transform_indices = @transform_14, window_bounds = array<i64: 1, 8>}, {transform_indices = @transform_15, window_bounds = array<i64: 1, 8, 8>}]} {
    %c0 = arith.constant 0 : index
    %c0_0 = arith.constant 0 : index
    %c0_1 = arith.constant 0 : index
    %0 = vector.load %arg2[%c0, %c0_0, %c0_1] : memref<1x8x10xf32, #tpu.memory_space<vmem>>, vector<1x8x10xf32>
    %1 = vector.shape_cast %0 : vector<1x8x10xf32> to vector<8x10xf32>
    %c0_2 = arith.constant 0 : index
    %c0_3 = arith.constant 0 : index
    %2 = vector.load %arg4[%c0_2, %c0_3] : memref<10x16xf32, #tpu.memory_space<vmem>>, vector<10x16xf32>
    %cst = arith.constant dense<0.000000e+00> : vector<8x16xf32>
    %3 = tpu.matmul %1, %2, %cst {dimension_numbers = #tpu.dot_dimension_numbers<[1], [0], [0], [1], [0, 0, 1, 1], [], []>} : vector<8x10xf32>, vector<10x16xf32>, vector<8x16xf32> -> vector<8x16xf32>
    %c0_4 = arith.constant 0 : index
    %c0_5 = arith.constant 0 : index
    %c0_6 = arith.constant 0 : index
    %4 = vector.load %arg1[%c0_4, %c0_5, %c0_6] : memref<1x8x16xf32, #tpu.memory_space<vmem>>, vector<1x8x16xf32>
    %5 = vector.shape_cast %4 : vector<1x8x16xf32> to vector<8x16xf32>
    %6 = arith.addf %5, %3 : vector<8x16xf32>
    %c0_7 = arith.constant 0 : index
    %c0_8 = arith.constant 0 : index
    %c0_9 = arith.constant 0 : index
    %7 = vector.load %arg3[%c0_7, %c0_8, %c0_9] : memref<1x1x16xf32, #tpu.memory_space<vmem>>, vector<1x1x16xf32>
    %8 = vector.shape_cast %7 : vector<1x1x16xf32> to vector<1x16xf32>
    %9 = vector.broadcast %8 : vector<1x16xf32> to vector<8x16xf32>
    %10 = arith.addf %6, %9 : vector<8x16xf32>
    %c0_10 = arith.constant 0 : index
    %c0_11 = arith.constant 0 : index
    %11 = vector.load %arg5[%c0_10, %c0_11] : memref<16x32xf32, #tpu.memory_space<vmem>>, vector<16x32xf32>
    %cst_12 = arith.constant dense<0.000000e+00> : vector<8x32xf32>
    %12 = tpu.matmul %10, %11, %cst_12 {dimension_numbers = #tpu.dot_dimension_numbers<[1], [0], [0], [1], [0, 0, 1, 1], [], []>} : vector<8x16xf32>, vector<16x32xf32>, vector<8x32xf32> -> vector<8x32xf32>
    %c0_13 = arith.constant 0 : index
    %c0_14 = arith.constant 0 : index
    %13 = vector.load %arg6[%c0_13, %c0_14] : memref<1x32xf32, #tpu.memory_space<vmem>>, vector<1x32xf32>
    %14 = vector.broadcast %13 : vector<1x32xf32> to vector<8x32xf32>
    %15 = arith.addf %12, %14 : vector<8x32xf32>
    %c0_15 = arith.constant 0 : index
    %c0_16 = arith.constant 0 : index
    %c0_17 = arith.constant 0 : index
    %16 = vector.load %arg12[%c0_15, %c0_16, %c0_17] : memref<2x6x32xf32, #tpu.memory_space<vmem>>, vector<1x6x32xf32>
    %17 = vector.shape_cast %16 : vector<1x6x32xf32> to vector<6x32xf32>
    %c0_18 = arith.constant 0 : index
    %c0_19 = arith.constant 0 : index
    %c0_20 = arith.constant 0 : index
    %18 = vector.load %arg11[%c0_18, %c0_19, %c0_20] : memref<2x1x96xf32, #tpu.memory_space<vmem>>, vector<1x1x96xf32>
    %19 = vector.shape_cast %18 : vector<1x1x96xf32> to vector<1x96xf32>
    %c0_21 = arith.constant 0 : index
    %c0_22 = arith.constant 0 : index
    %c0_23 = arith.constant 0 : index
    %20 = vector.load %arg7[%c0_21, %c0_22, %c0_23] : memref<2x32x96xf32, #tpu.memory_space<vmem>>, vector<1x32x96xf32>
    %21 = vector.shape_cast %20 : vector<1x32x96xf32> to vector<32x96xf32>
    %cst_24 = arith.constant dense<0.000000e+00> : vector<8x96xf32>
    %22 = tpu.matmul %15, %21, %cst_24 {dimension_numbers = #tpu.dot_dimension_numbers<[1], [0], [0], [1], [0, 0, 1, 1], [], []>} : vector<8x32xf32>, vector<32x96xf32>, vector<8x96xf32> -> vector<8x96xf32>
    %23 = vector.broadcast %19 : vector<1x96xf32> to vector<8x96xf32>
    %24 = arith.addf %22, %23 : vector<8x96xf32>
    %25 = vector.extract_strided_slice %24 {offsets = [0, 0], sizes = [8, 16], strides = [1, 1]} : vector<8x96xf32> to vector<8x16xf32>
    %26 = vector.extract_strided_slice %24 {offsets = [0, 16], sizes = [8, 16], strides = [1, 1]} : vector<8x96xf32> to vector<8x16xf32>
    %27 = vector.shape_cast %25 : vector<8x16xf32> to vector<1x8x16xf32>
    %28 = vector.shape_cast %26 : vector<8x16xf32> to vector<1x8x16xf32>
    %29 = tpu.concatenate %27, %28 in 0 : vector<1x8x16xf32>, vector<1x8x16xf32> -> vector<2x8x16xf32>
    %30 = vector.extract_strided_slice %24 {offsets = [0, 32], sizes = [8, 16], strides = [1, 1]} : vector<8x96xf32> to vector<8x16xf32>
    %31 = vector.extract_strided_slice %24 {offsets = [0, 48], sizes = [8, 16], strides = [1, 1]} : vector<8x96xf32> to vector<8x16xf32>
    %32 = vector.shape_cast %30 : vector<8x16xf32> to vector<1x8x16xf32>
    %33 = vector.shape_cast %31 : vector<8x16xf32> to vector<1x8x16xf32>
    %34 = tpu.concatenate %32, %33 in 0 : vector<1x8x16xf32>, vector<1x8x16xf32> -> vector<2x8x16xf32>
    %35 = vector.extract_strided_slice %24 {offsets = [0, 64], sizes = [8, 16], strides = [1, 1]} : vector<8x96xf32> to vector<8x16xf32>
    %36 = vector.extract_strided_slice %24 {offsets = [0, 80], sizes = [8, 16], strides = [1, 1]} : vector<8x96xf32> to vector<8x16xf32>
    %37 = vector.shape_cast %35 : vector<8x16xf32> to vector<1x8x16xf32>
    %38 = vector.shape_cast %36 : vector<8x16xf32> to vector<1x8x16xf32>
    %39 = tpu.concatenate %37, %38 in 0 : vector<1x8x16xf32>, vector<1x8x16xf32> -> vector<2x8x16xf32>
    "tpu.trace_start"() <{level = 10 : i32, message = "hqd,hkd->hqk"}> : () -> ()
    %cst_25 = arith.constant dense<0.000000e+00> : vector<2x8x8xf32>
    %40 = tpu.matmul %29, %34, %cst_25 {dimension_numbers = #tpu.dot_dimension_numbers<[2], [2], [1], [1], [0, 0, 0, 1, 1, 1], [0], [0]>} : vector<2x8x16xf32>, vector<2x8x16xf32>, vector<2x8x8xf32> -> vector<2x8x8xf32>
    "tpu.trace_stop"() : () -> ()
    %cst_26 = arith.constant 2.500000e-01 : f32
    %41 = vector.broadcast %cst_26 : f32 to vector<2x8x8xf32>
    %42 = arith.mulf %40, %41 : vector<2x8x8xf32>
    %cst_27 = arith.constant dense<0xFF800000> : vector<2x8xf32>
    %43 = vector.multi_reduction <maximumf>, %42, %cst_27 [2] : vector<2x8x8xf32> to vector<2x8xf32>
    %44 = vector.shape_cast %43 : vector<2x8xf32> to vector<2x8x1xf32>
    %45 = vector.broadcast %44 : vector<2x8x1xf32> to vector<2x8x8xf32>
    %46 = arith.subf %42, %45 : vector<2x8x8xf32>
    %47 = math.exp %46 : vector<2x8x8xf32>
    %cst_28 = arith.constant dense<0.000000e+00> : vector<2x8xf32>
    %48 = vector.multi_reduction <add>, %47, %cst_28 [2] : vector<2x8x8xf32> to vector<2x8xf32>
    %49 = vector.shape_cast %48 : vector<2x8xf32> to vector<2x8x1xf32>
    %50 = tpu.reciprocal %49 {approx = true} : vector<2x8x1xf32> -> vector<2x8x1xf32>
    %51 = vector.broadcast %50 : vector<2x8x1xf32> to vector<2x8x8xf32>
    %52 = arith.mulf %47, %51 : vector<2x8x8xf32>
    "tpu.trace_start"() <{level = 10 : i32, message = "hqk,hkd->hqd"}> : () -> ()
    %cst_29 = arith.constant dense<0.000000e+00> : vector<2x8x16xf32>
    %53 = tpu.matmul %52, %39, %cst_29 {dimension_numbers = #tpu.dot_dimension_numbers<[2], [1], [1], [2], [0, 0, 0, 1, 1, 2], [0], [0]>} : vector<2x8x8xf32>, vector<2x8x16xf32>, vector<2x8x16xf32> -> vector<2x8x16xf32>
    "tpu.trace_stop"() : () -> ()
    %54 = vector.extract_strided_slice %53 {offsets = [0, 0, 0], sizes = [1, 8, 16], strides = [1, 1, 1]} : vector<2x8x16xf32> to vector<1x8x16xf32>
    %55 = vector.shape_cast %54 : vector<1x8x16xf32> to vector<8x16xf32>
    %56 = vector.extract_strided_slice %53 {offsets = [1, 0, 0], sizes = [1, 8, 16], strides = [1, 1, 1]} : vector<2x8x16xf32> to vector<1x8x16xf32>
    %57 = vector.shape_cast %56 : vector<1x8x16xf32> to vector<8x16xf32>
    %58 = tpu.concatenate %55, %57 in 1 : vector<8x16xf32>, vector<8x16xf32> -> vector<8x32xf32>
    %c0_30 = arith.constant 0 : index
    %c0_31 = arith.constant 0 : index
    %c0_32 = arith.constant 0 : index
    %59 = vector.load %arg8[%c0_30, %c0_31, %c0_32] : memref<2x32x32xf32, #tpu.memory_space<vmem>>, vector<1x32x32xf32>
    %60 = vector.shape_cast %59 : vector<1x32x32xf32> to vector<32x32xf32>
    %cst_33 = arith.constant dense<0.000000e+00> : vector<8x32xf32>
    %61 = tpu.matmul %58, %60, %cst_33 {dimension_numbers = #tpu.dot_dimension_numbers<[1], [0], [0], [1], [0, 0, 1, 1], [], []>} : vector<8x32xf32>, vector<32x32xf32>, vector<8x32xf32> -> vector<8x32xf32>
    %62 = vector.extract_strided_slice %17 {offsets = [0, 0], sizes = [1, 32], strides = [1, 1]} : vector<6x32xf32> to vector<1x32xf32>
    %63 = vector.broadcast %62 : vector<1x32xf32> to vector<8x32xf32>
    %64 = arith.addf %61, %63 : vector<8x32xf32>
    %65 = arith.addf %15, %64 : vector<8x32xf32>
    %66 = vector.extract_strided_slice %17 {offsets = [1, 0], sizes = [1, 32], strides = [1, 1]} : vector<6x32xf32> to vector<1x32xf32>
    %67 = vector.extract_strided_slice %17 {offsets = [2, 0], sizes = [1, 32], strides = [1, 1]} : vector<6x32xf32> to vector<1x32xf32>
    %cst_34 = arith.constant dense<0.000000e+00> : vector<8xf32>
    %68 = vector.multi_reduction <add>, %65, %cst_34 [1] : vector<8x32xf32> to vector<8xf32>
    %69 = vector.shape_cast %68 : vector<8xf32> to vector<8x1xf32>
    %cst_35 = arith.constant 3.200000e+01 : f32
    %70 = vector.broadcast %cst_35 : f32 to vector<8x1xf32>
    %71 = arith.divf %69, %70 : vector<8x1xf32>
    %72 = vector.broadcast %71 : vector<8x1xf32> to vector<8x32xf32>
    %73 = arith.subf %65, %72 : vector<8x32xf32>
    %74 = arith.mulf %73, %73 : vector<8x32xf32>
    %cst_36 = arith.constant dense<0.000000e+00> : vector<8xf32>
    %75 = vector.multi_reduction <add>, %74, %cst_36 [1] : vector<8x32xf32> to vector<8xf32>
    %76 = vector.shape_cast %75 : vector<8xf32> to vector<8x1xf32>
    %cst_37 = arith.constant 3.200000e+01 : f32
    %77 = vector.broadcast %cst_37 : f32 to vector<8x1xf32>
    %78 = arith.divf %76, %77 : vector<8x1xf32>
    %79 = vector.broadcast %71 : vector<8x1xf32> to vector<8x32xf32>
    %80 = arith.subf %65, %79 : vector<8x32xf32>
    %cst_38 = arith.constant 9.99999974E-6 : f32
    %81 = vector.broadcast %cst_38 : f32 to vector<8x1xf32>
    %82 = arith.addf %78, %81 : vector<8x1xf32>
    %83 = math.rsqrt %82 : vector<8x1xf32>
    %84 = vector.broadcast %83 : vector<8x1xf32> to vector<8x32xf32>
    %85 = arith.mulf %80, %84 : vector<8x32xf32>
    %86 = vector.broadcast %66 : vector<1x32xf32> to vector<8x32xf32>
    %87 = arith.mulf %85, %86 : vector<8x32xf32>
    %88 = vector.broadcast %67 : vector<1x32xf32> to vector<8x32xf32>
    %89 = arith.addf %87, %88 : vector<8x32xf32>
    %c0_39 = arith.constant 0 : index
    %c0_40 = arith.constant 0 : index
    %c0_41 = arith.constant 0 : index
    %90 = vector.load %arg9[%c0_39, %c0_40, %c0_41] : memref<2x32x64xf32, #tpu.memory_space<vmem>>, vector<1x32x64xf32>
    %91 = vector.shape_cast %90 : vector<1x32x64xf32> to vector<32x64xf32>
    %cst_42 = arith.constant dense<0.000000e+00> : vector<8x64xf32>
    %92 = tpu.matmul %89, %91, %cst_42 {dimension_numbers = #tpu.dot_dimension_numbers<[1], [0], [0], [1], [0, 0, 1, 1], [], []>} : vector<8x32xf32>, vector<32x64xf32>, vector<8x64xf32> -> vector<8x64xf32>
    %c0_43 = arith.constant 0 : index
    %c0_44 = arith.constant 0 : index
    %c0_45 = arith.constant 0 : index
    %93 = vector.load %arg13[%c0_43, %c0_44, %c0_45] : memref<2x1x64xf32, #tpu.memory_space<vmem>>, vector<1x1x64xf32>
    %94 = vector.shape_cast %93 : vector<1x1x64xf32> to vector<1x64xf32>
    %95 = vector.broadcast %94 : vector<1x64xf32> to vector<8x64xf32>
    %96 = arith.addf %92, %95 : vector<8x64xf32>
    %cst_46 = arith.constant 0.000000e+00 : f32
    %97 = vector.broadcast %cst_46 : f32 to vector<8x64xf32>
    %98 = arith.maximumf %96, %97 : vector<8x64xf32>
    %c0_47 = arith.constant 0 : index
    %c0_48 = arith.constant 0 : index
    %c0_49 = arith.constant 0 : index
    %99 = vector.load %arg10[%c0_47, %c0_48, %c0_49] : memref<2x64x32xf32, #tpu.memory_space<vmem>>, vector<1x64x32xf32>
    %100 = vector.shape_cast %99 : vector<1x64x32xf32> to vector<64x32xf32>
    %cst_50 = arith.constant dense<0.000000e+00> : vector<8x32xf32>
    %101 = tpu.matmul %98, %100, %cst_50 {dimension_numbers = #tpu.dot_dimension_numbers<[1], [0], [0], [1], [0, 0, 1, 1], [], []>} : vector<8x64xf32>, vector<64x32xf32>, vector<8x32xf32> -> vector<8x32xf32>
    %102 = vector.extract_strided_slice %17 {offsets = [3, 0], sizes = [1, 32], strides = [1, 1]} : vector<6x32xf32> to vector<1x32xf32>
    %103 = vector.broadcast %102 : vector<1x32xf32> to vector<8x32xf32>
    %104 = arith.addf %101, %103 : vector<8x32xf32>
    %105 = arith.addf %89, %104 : vector<8x32xf32>
    %106 = vector.extract_strided_slice %17 {offsets = [4, 0], sizes = [1, 32], strides = [1, 1]} : vector<6x32xf32> to vector<1x32xf32>
    %107 = vector.extract_strided_slice %17 {offsets = [5, 0], sizes = [1, 32], strides = [1, 1]} : vector<6x32xf32> to vector<1x32xf32>
    %cst_51 = arith.constant dense<0.000000e+00> : vector<8xf32>
    %108 = vector.multi_reduction <add>, %105, %cst_51 [1] : vector<8x32xf32> to vector<8xf32>
    %109 = vector.shape_cast %108 : vector<8xf32> to vector<8x1xf32>
    %cst_52 = arith.constant 3.200000e+01 : f32
    %110 = vector.broadcast %cst_52 : f32 to vector<8x1xf32>
    %111 = arith.divf %109, %110 : vector<8x1xf32>
    %112 = vector.broadcast %111 : vector<8x1xf32> to vector<8x32xf32>
    %113 = arith.subf %105, %112 : vector<8x32xf32>
    %114 = arith.mulf %113, %113 : vector<8x32xf32>
    %cst_53 = arith.constant dense<0.000000e+00> : vector<8xf32>
    %115 = vector.multi_reduction <add>, %114, %cst_53 [1] : vector<8x32xf32> to vector<8xf32>
    %116 = vector.shape_cast %115 : vector<8xf32> to vector<8x1xf32>
    %cst_54 = arith.constant 3.200000e+01 : f32
    %117 = vector.broadcast %cst_54 : f32 to vector<8x1xf32>
    %118 = arith.divf %116, %117 : vector<8x1xf32>
    %119 = vector.broadcast %111 : vector<8x1xf32> to vector<8x32xf32>
    %120 = arith.subf %105, %119 : vector<8x32xf32>
    %cst_55 = arith.constant 9.99999974E-6 : f32
    %121 = vector.broadcast %cst_55 : f32 to vector<8x1xf32>
    %122 = arith.addf %118, %121 : vector<8x1xf32>
    %123 = math.rsqrt %122 : vector<8x1xf32>
    %124 = vector.broadcast %123 : vector<8x1xf32> to vector<8x32xf32>
    %125 = arith.mulf %120, %124 : vector<8x32xf32>
    %126 = vector.broadcast %106 : vector<1x32xf32> to vector<8x32xf32>
    %127 = arith.mulf %125, %126 : vector<8x32xf32>
    %128 = vector.broadcast %107 : vector<1x32xf32> to vector<8x32xf32>
    %129 = arith.addf %127, %128 : vector<8x32xf32>
    %c1 = arith.constant 1 : index
    %c0_56 = arith.constant 0 : index
    %c0_57 = arith.constant 0 : index
    %130 = vector.load %arg12[%c1, %c0_56, %c0_57] : memref<2x6x32xf32, #tpu.memory_space<vmem>>, vector<1x6x32xf32>
    %131 = vector.shape_cast %130 : vector<1x6x32xf32> to vector<6x32xf32>
    %c1_58 = arith.constant 1 : index
    %c0_59 = arith.constant 0 : index
    %c0_60 = arith.constant 0 : index
    %132 = vector.load %arg11[%c1_58, %c0_59, %c0_60] : memref<2x1x96xf32, #tpu.memory_space<vmem>>, vector<1x1x96xf32>
    %133 = vector.shape_cast %132 : vector<1x1x96xf32> to vector<1x96xf32>
    %c1_61 = arith.constant 1 : index
    %c0_62 = arith.constant 0 : index
    %c0_63 = arith.constant 0 : index
    %134 = vector.load %arg7[%c1_61, %c0_62, %c0_63] : memref<2x32x96xf32, #tpu.memory_space<vmem>>, vector<1x32x96xf32>
    %135 = vector.shape_cast %134 : vector<1x32x96xf32> to vector<32x96xf32>
    %cst_64 = arith.constant dense<0.000000e+00> : vector<8x96xf32>
    %136 = tpu.matmul %129, %135, %cst_64 {dimension_numbers = #tpu.dot_dimension_numbers<[1], [0], [0], [1], [0, 0, 1, 1], [], []>} : vector<8x32xf32>, vector<32x96xf32>, vector<8x96xf32> -> vector<8x96xf32>
    %137 = vector.broadcast %133 : vector<1x96xf32> to vector<8x96xf32>
    %138 = arith.addf %136, %137 : vector<8x96xf32>
    %139 = vector.extract_strided_slice %138 {offsets = [0, 0], sizes = [8, 16], strides = [1, 1]} : vector<8x96xf32> to vector<8x16xf32>
    %140 = vector.extract_strided_slice %138 {offsets = [0, 16], sizes = [8, 16], strides = [1, 1]} : vector<8x96xf32> to vector<8x16xf32>
    %141 = vector.shape_cast %139 : vector<8x16xf32> to vector<1x8x16xf32>
    %142 = vector.shape_cast %140 : vector<8x16xf32> to vector<1x8x16xf32>
    %143 = tpu.concatenate %141, %142 in 0 : vector<1x8x16xf32>, vector<1x8x16xf32> -> vector<2x8x16xf32>
    %144 = vector.extract_strided_slice %138 {offsets = [0, 32], sizes = [8, 16], strides = [1, 1]} : vector<8x96xf32> to vector<8x16xf32>
    %145 = vector.extract_strided_slice %138 {offsets = [0, 48], sizes = [8, 16], strides = [1, 1]} : vector<8x96xf32> to vector<8x16xf32>
    %146 = vector.shape_cast %144 : vector<8x16xf32> to vector<1x8x16xf32>
    %147 = vector.shape_cast %145 : vector<8x16xf32> to vector<1x8x16xf32>
    %148 = tpu.concatenate %146, %147 in 0 : vector<1x8x16xf32>, vector<1x8x16xf32> -> vector<2x8x16xf32>
    %149 = vector.extract_strided_slice %138 {offsets = [0, 64], sizes = [8, 16], strides = [1, 1]} : vector<8x96xf32> to vector<8x16xf32>
    %150 = vector.extract_strided_slice %138 {offsets = [0, 80], sizes = [8, 16], strides = [1, 1]} : vector<8x96xf32> to vector<8x16xf32>
    %151 = vector.shape_cast %149 : vector<8x16xf32> to vector<1x8x16xf32>
    %152 = vector.shape_cast %150 : vector<8x16xf32> to vector<1x8x16xf32>
    %153 = tpu.concatenate %151, %152 in 0 : vector<1x8x16xf32>, vector<1x8x16xf32> -> vector<2x8x16xf32>
    "tpu.trace_start"() <{level = 10 : i32, message = "hqd,hkd->hqk"}> : () -> ()
    %cst_65 = arith.constant dense<0.000000e+00> : vector<2x8x8xf32>
    %154 = tpu.matmul %143, %148, %cst_65 {dimension_numbers = #tpu.dot_dimension_numbers<[2], [2], [1], [1], [0, 0, 0, 1, 1, 1], [0], [0]>} : vector<2x8x16xf32>, vector<2x8x16xf32>, vector<2x8x8xf32> -> vector<2x8x8xf32>
    "tpu.trace_stop"() : () -> ()
    %cst_66 = arith.constant 2.500000e-01 : f32
    %155 = vector.broadcast %cst_66 : f32 to vector<2x8x8xf32>
    %156 = arith.mulf %154, %155 : vector<2x8x8xf32>
    %cst_67 = arith.constant dense<0xFF800000> : vector<2x8xf32>
    %157 = vector.multi_reduction <maximumf>, %156, %cst_67 [2] : vector<2x8x8xf32> to vector<2x8xf32>
    %158 = vector.shape_cast %157 : vector<2x8xf32> to vector<2x8x1xf32>
    %159 = vector.broadcast %158 : vector<2x8x1xf32> to vector<2x8x8xf32>
    %160 = arith.subf %156, %159 : vector<2x8x8xf32>
    %161 = math.exp %160 : vector<2x8x8xf32>
    %cst_68 = arith.constant dense<0.000000e+00> : vector<2x8xf32>
    %162 = vector.multi_reduction <add>, %161, %cst_68 [2] : vector<2x8x8xf32> to vector<2x8xf32>
    %163 = vector.shape_cast %162 : vector<2x8xf32> to vector<2x8x1xf32>
    %164 = tpu.reciprocal %163 {approx = true} : vector<2x8x1xf32> -> vector<2x8x1xf32>
    %165 = vector.broadcast %164 : vector<2x8x1xf32> to vector<2x8x8xf32>
    %166 = arith.mulf %161, %165 : vector<2x8x8xf32>
    "tpu.trace_start"() <{level = 10 : i32, message = "hqk,hkd->hqd"}> : () -> ()
    %cst_69 = arith.constant dense<0.000000e+00> : vector<2x8x16xf32>
    %167 = tpu.matmul %166, %153, %cst_69 {dimension_numbers = #tpu.dot_dimension_numbers<[2], [1], [1], [2], [0, 0, 0, 1, 1, 2], [0], [0]>} : vector<2x8x8xf32>, vector<2x8x16xf32>, vector<2x8x16xf32> -> vector<2x8x16xf32>
    "tpu.trace_stop"() : () -> ()
    %168 = vector.extract_strided_slice %167 {offsets = [0, 0, 0], sizes = [1, 8, 16], strides = [1, 1, 1]} : vector<2x8x16xf32> to vector<1x8x16xf32>
    %169 = vector.shape_cast %168 : vector<1x8x16xf32> to vector<8x16xf32>
    %170 = vector.extract_strided_slice %167 {offsets = [1, 0, 0], sizes = [1, 8, 16], strides = [1, 1, 1]} : vector<2x8x16xf32> to vector<1x8x16xf32>
    %171 = vector.shape_cast %170 : vector<1x8x16xf32> to vector<8x16xf32>
    %172 = tpu.concatenate %169, %171 in 1 : vector<8x16xf32>, vector<8x16xf32> -> vector<8x32xf32>
    %c1_70 = arith.constant 1 : index
    %c0_71 = arith.constant 0 : index
    %c0_72 = arith.constant 0 : index
    %173 = vector.load %arg8[%c1_70, %c0_71, %c0_72] : memref<2x32x32xf32, #tpu.memory_space<vmem>>, vector<1x32x32xf32>
    %174 = vector.shape_cast %173 : vector<1x32x32xf32> to vector<32x32xf32>
    %cst_73 = arith.constant dense<0.000000e+00> : vector<8x32xf32>
    %175 = tpu.matmul %172, %174, %cst_73 {dimension_numbers = #tpu.dot_dimension_numbers<[1], [0], [0], [1], [0, 0, 1, 1], [], []>} : vector<8x32xf32>, vector<32x32xf32>, vector<8x32xf32> -> vector<8x32xf32>
    %176 = vector.extract_strided_slice %131 {offsets = [0, 0], sizes = [1, 32], strides = [1, 1]} : vector<6x32xf32> to vector<1x32xf32>
    %177 = vector.broadcast %176 : vector<1x32xf32> to vector<8x32xf32>
    %178 = arith.addf %175, %177 : vector<8x32xf32>
    %179 = arith.addf %129, %178 : vector<8x32xf32>
    %180 = vector.extract_strided_slice %131 {offsets = [1, 0], sizes = [1, 32], strides = [1, 1]} : vector<6x32xf32> to vector<1x32xf32>
    %181 = vector.extract_strided_slice %131 {offsets = [2, 0], sizes = [1, 32], strides = [1, 1]} : vector<6x32xf32> to vector<1x32xf32>
    %cst_74 = arith.constant dense<0.000000e+00> : vector<8xf32>
    %182 = vector.multi_reduction <add>, %179, %cst_74 [1] : vector<8x32xf32> to vector<8xf32>
    %183 = vector.shape_cast %182 : vector<8xf32> to vector<8x1xf32>
    %cst_75 = arith.constant 3.200000e+01 : f32
    %184 = vector.broadcast %cst_75 : f32 to vector<8x1xf32>
    %185 = arith.divf %183, %184 : vector<8x1xf32>
    %186 = vector.broadcast %185 : vector<8x1xf32> to vector<8x32xf32>
    %187 = arith.subf %179, %186 : vector<8x32xf32>
    %188 = arith.mulf %187, %187 : vector<8x32xf32>
    %cst_76 = arith.constant dense<0.000000e+00> : vector<8xf32>
    %189 = vector.multi_reduction <add>, %188, %cst_76 [1] : vector<8x32xf32> to vector<8xf32>
    %190 = vector.shape_cast %189 : vector<8xf32> to vector<8x1xf32>
    %cst_77 = arith.constant 3.200000e+01 : f32
    %191 = vector.broadcast %cst_77 : f32 to vector<8x1xf32>
    %192 = arith.divf %190, %191 : vector<8x1xf32>
    %193 = vector.broadcast %185 : vector<8x1xf32> to vector<8x32xf32>
    %194 = arith.subf %179, %193 : vector<8x32xf32>
    %cst_78 = arith.constant 9.99999974E-6 : f32
    %195 = vector.broadcast %cst_78 : f32 to vector<8x1xf32>
    %196 = arith.addf %192, %195 : vector<8x1xf32>
    %197 = math.rsqrt %196 : vector<8x1xf32>
    %198 = vector.broadcast %197 : vector<8x1xf32> to vector<8x32xf32>
    %199 = arith.mulf %194, %198 : vector<8x32xf32>
    %200 = vector.broadcast %180 : vector<1x32xf32> to vector<8x32xf32>
    %201 = arith.mulf %199, %200 : vector<8x32xf32>
    %202 = vector.broadcast %181 : vector<1x32xf32> to vector<8x32xf32>
    %203 = arith.addf %201, %202 : vector<8x32xf32>
    %c1_79 = arith.constant 1 : index
    %c0_80 = arith.constant 0 : index
    %c0_81 = arith.constant 0 : index
    %204 = vector.load %arg9[%c1_79, %c0_80, %c0_81] : memref<2x32x64xf32, #tpu.memory_space<vmem>>, vector<1x32x64xf32>
    %205 = vector.shape_cast %204 : vector<1x32x64xf32> to vector<32x64xf32>
    %cst_82 = arith.constant dense<0.000000e+00> : vector<8x64xf32>
    %206 = tpu.matmul %203, %205, %cst_82 {dimension_numbers = #tpu.dot_dimension_numbers<[1], [0], [0], [1], [0, 0, 1, 1], [], []>} : vector<8x32xf32>, vector<32x64xf32>, vector<8x64xf32> -> vector<8x64xf32>
    %c1_83 = arith.constant 1 : index
    %c0_84 = arith.constant 0 : index
    %c0_85 = arith.constant 0 : index
    %207 = vector.load %arg13[%c1_83, %c0_84, %c0_85] : memref<2x1x64xf32, #tpu.memory_space<vmem>>, vector<1x1x64xf32>
    %208 = vector.shape_cast %207 : vector<1x1x64xf32> to vector<1x64xf32>
    %209 = vector.broadcast %208 : vector<1x64xf32> to vector<8x64xf32>
    %210 = arith.addf %206, %209 : vector<8x64xf32>
    %cst_86 = arith.constant 0.000000e+00 : f32
    %211 = vector.broadcast %cst_86 : f32 to vector<8x64xf32>
    %212 = arith.maximumf %210, %211 : vector<8x64xf32>
    %c1_87 = arith.constant 1 : index
    %c0_88 = arith.constant 0 : index
    %c0_89 = arith.constant 0 : index
    %213 = vector.load %arg10[%c1_87, %c0_88, %c0_89] : memref<2x64x32xf32, #tpu.memory_space<vmem>>, vector<1x64x32xf32>
    %214 = vector.shape_cast %213 : vector<1x64x32xf32> to vector<64x32xf32>
    %cst_90 = arith.constant dense<0.000000e+00> : vector<8x32xf32>
    %215 = tpu.matmul %212, %214, %cst_90 {dimension_numbers = #tpu.dot_dimension_numbers<[1], [0], [0], [1], [0, 0, 1, 1], [], []>} : vector<8x64xf32>, vector<64x32xf32>, vector<8x32xf32> -> vector<8x32xf32>
    %216 = vector.extract_strided_slice %131 {offsets = [3, 0], sizes = [1, 32], strides = [1, 1]} : vector<6x32xf32> to vector<1x32xf32>
    %217 = vector.broadcast %216 : vector<1x32xf32> to vector<8x32xf32>
    %218 = arith.addf %215, %217 : vector<8x32xf32>
    %219 = arith.addf %203, %218 : vector<8x32xf32>
    %220 = vector.extract_strided_slice %131 {offsets = [4, 0], sizes = [1, 32], strides = [1, 1]} : vector<6x32xf32> to vector<1x32xf32>
    %221 = vector.extract_strided_slice %131 {offsets = [5, 0], sizes = [1, 32], strides = [1, 1]} : vector<6x32xf32> to vector<1x32xf32>
    %cst_91 = arith.constant dense<0.000000e+00> : vector<8xf32>
    %222 = vector.multi_reduction <add>, %219, %cst_91 [1] : vector<8x32xf32> to vector<8xf32>
    %223 = vector.shape_cast %222 : vector<8xf32> to vector<8x1xf32>
    %cst_92 = arith.constant 3.200000e+01 : f32
    %224 = vector.broadcast %cst_92 : f32 to vector<8x1xf32>
    %225 = arith.divf %223, %224 : vector<8x1xf32>
    %226 = vector.broadcast %225 : vector<8x1xf32> to vector<8x32xf32>
    %227 = arith.subf %219, %226 : vector<8x32xf32>
    %228 = arith.mulf %227, %227 : vector<8x32xf32>
    %cst_93 = arith.constant dense<0.000000e+00> : vector<8xf32>
    %229 = vector.multi_reduction <add>, %228, %cst_93 [1] : vector<8x32xf32> to vector<8xf32>
    %230 = vector.shape_cast %229 : vector<8xf32> to vector<8x1xf32>
    %cst_94 = arith.constant 3.200000e+01 : f32
    %231 = vector.broadcast %cst_94 : f32 to vector<8x1xf32>
    %232 = arith.divf %230, %231 : vector<8x1xf32>
    %233 = vector.broadcast %225 : vector<8x1xf32> to vector<8x32xf32>
    %234 = arith.subf %219, %233 : vector<8x32xf32>
    %cst_95 = arith.constant 9.99999974E-6 : f32
    %235 = vector.broadcast %cst_95 : f32 to vector<8x1xf32>
    %236 = arith.addf %232, %235 : vector<8x1xf32>
    %237 = math.rsqrt %236 : vector<8x1xf32>
    %238 = vector.broadcast %237 : vector<8x1xf32> to vector<8x32xf32>
    %239 = arith.mulf %234, %238 : vector<8x32xf32>
    %240 = vector.broadcast %220 : vector<1x32xf32> to vector<8x32xf32>
    %241 = arith.mulf %239, %240 : vector<8x32xf32>
    %242 = vector.broadcast %221 : vector<1x32xf32> to vector<8x32xf32>
    %243 = arith.addf %241, %242 : vector<8x32xf32>
    %c0_96 = arith.constant 0 : index
    %c0_97 = arith.constant 0 : index
    %244 = vector.load %arg14[%c0_96, %c0_97] : memref<32x8xf32, #tpu.memory_space<vmem>>, vector<32x8xf32>
    %cst_98 = arith.constant dense<0.000000e+00> : vector<8x8xf32>
    %245 = tpu.matmul %243, %244, %cst_98 {dimension_numbers = #tpu.dot_dimension_numbers<[1], [0], [0], [1], [0, 0, 1, 1], [], []>} : vector<8x32xf32>, vector<32x8xf32>, vector<8x8xf32> -> vector<8x8xf32>
    %c0_99 = arith.constant 0 : index
    %c0_100 = arith.constant 0 : index
    %246 = vector.load %arg15[%c0_99, %c0_100] : memref<1x8xf32, #tpu.memory_space<vmem>>, vector<1x8xf32>
    %247 = vector.broadcast %246 : vector<1x8xf32> to vector<8x8xf32>
    %248 = arith.addf %245, %247 : vector<8x8xf32>
    %c0_101 = arith.constant 0 : index
    %c0_102 = arith.constant 0 : index
    %c0_103 = arith.constant 0 : index
    %249 = vector.load %arg16[%c0_101, %c0_102, %c0_103] : memref<1x8x8xf32, #tpu.memory_space<vmem>>, vector<1x8x8xf32>
    %250 = vector.shape_cast %249 : vector<1x8x8xf32> to vector<8x8xf32>
    %251 = vector.shape_cast %248 : vector<8x8xf32> to vector<1x8x8xf32>
    tpu.vector_store %arg16[%c0_101, %c0_102, %c0_103], %251 {strides = array<i32>} : memref<1x8x8xf32, #tpu.memory_space<vmem>>, vector<1x8x8xf32>,
    return
  }
  func.func @transform_0(%arg0: i32) -> (i32, i32, i32) {
    %c0_i32 = arith.constant 0 : i32
    %c0_i32_0 = arith.constant 0 : i32
    %c0_i32_1 = arith.constant 0 : i32
    return %arg0, %c0_i32, %c0_i32_0 : i32, i32, i32
  }
  func.func @transform_1(%arg0: i32) -> (i32, i32, i32) {
    %c0_i32 = arith.constant 0 : i32
    %c0_i32_0 = arith.constant 0 : i32
    %c0_i32_1 = arith.constant 0 : i32
    return %arg0, %c0_i32, %c0_i32_0 : i32, i32, i32
  }
  func.func @transform_2(%arg0: i32) -> (i32, i32, i32) {
    %c0_i32 = arith.constant 0 : i32
    %c0_i32_0 = arith.constant 0 : i32
    %c0_i32_1 = arith.constant 0 : i32
    return %arg0, %c0_i32, %c0_i32_0 : i32, i32, i32
  }
  func.func @transform_3(%arg0: i32) -> (i32, i32) {
    %c0_i32 = arith.constant 0 : i32
    %c0_i32_0 = arith.constant 0 : i32
    %c0_i32_1 = arith.constant 0 : i32
    return %c0_i32, %c0_i32_0 : i32, i32
  }
  func.func @transform_4(%arg0: i32) -> (i32, i32) {
    %c0_i32 = arith.constant 0 : i32
    %c0_i32_0 = arith.constant 0 : i32
    %c0_i32_1 = arith.constant 0 : i32
    return %c0_i32, %c0_i32_0 : i32, i32
  }
  func.func @transform_5(%arg0: i32) -> (i32, i32) {
    %c0_i32 = arith.constant 0 : i32
    %c0_i32_0 = arith.constant 0 : i32
    %c0_i32_1 = arith.constant 0 : i32
    return %c0_i32, %c0_i32_0 : i32, i32
  }
  func.func @transform_6(%arg0: i32) -> (i32, i32, i32) {
    %c0_i32 = arith.constant 0 : i32
    %c0_i32_0 = arith.constant 0 : i32
    %c0_i32_1 = arith.constant 0 : i32
    %c0_i32_2 = arith.constant 0 : i32
    return %c0_i32, %c0_i32_0, %c0_i32_1 : i32, i32, i32
  }
  func.func @transform_7(%arg0: i32) -> (i32, i32, i32) {
    %c0_i32 = arith.constant 0 : i32
    %c0_i32_0 = arith.constant 0 : i32
    %c0_i32_1 = arith.constant 0 : i32
    %c0_i32_2 = arith.constant 0 : i32
    return %c0_i32, %c0_i32_0, %c0_i32_1 : i32, i32, i32
  }
  func.func @transform_8(%arg0: i32) -> (i32, i32, i32) {
    %c0_i32 = arith.constant 0 : i32
    %c0_i32_0 = arith.constant 0 : i32
    %c0_i32_1 = arith.constant 0 : i32
    %c0_i32_2 = arith.constant 0 : i32
    return %c0_i32, %c0_i32_0, %c0_i32_1 : i32, i32, i32
  }
  func.func @transform_9(%arg0: i32) -> (i32, i32, i32) {
    %c0_i32 = arith.constant 0 : i32
    %c0_i32_0 = arith.constant 0 : i32
    %c0_i32_1 = arith.constant 0 : i32
    %c0_i32_2 = arith.constant 0 : i32
    return %c0_i32, %c0_i32_0, %c0_i32_1 : i32, i32, i32
  }
  func.func @transform_10(%arg0: i32) -> (i32, i32, i32) {
    %c0_i32 = arith.constant 0 : i32
    %c0_i32_0 = arith.constant 0 : i32
    %c0_i32_1 = arith.constant 0 : i32
    %c0_i32_2 = arith.constant 0 : i32
    return %c0_i32, %c0_i32_0, %c0_i32_1 : i32, i32, i32
  }
  func.func @transform_11(%arg0: i32) -> (i32, i32, i32) {
    %c0_i32 = arith.constant 0 : i32
    %c0_i32_0 = arith.constant 0 : i32
    %c0_i32_1 = arith.constant 0 : i32
    %c0_i32_2 = arith.constant 0 : i32
    return %c0_i32, %c0_i32_0, %c0_i32_1 : i32, i32, i32
  }
  func.func @transform_12(%arg0: i32) -> (i32, i32, i32) {
    %c0_i32 = arith.constant 0 : i32
    %c0_i32_0 = arith.constant 0 : i32
    %c0_i32_1 = arith.constant 0 : i32
    %c0_i32_2 = arith.constant 0 : i32
    return %c0_i32, %c0_i32_0, %c0_i32_1 : i32, i32, i32
  }
  func.func @transform_13(%arg0: i32) -> (i32, i32) {
    %c0_i32 = arith.constant 0 : i32
    %c0_i32_0 = arith.constant 0 : i32
    %c0_i32_1 = arith.constant 0 : i32
    return %c0_i32, %c0_i32_0 : i32, i32
  }
  func.func @transform_14(%arg0: i32) -> (i32, i32) {
    %c0_i32 = arith.constant 0 : i32
    %c0_i32_0 = arith.constant 0 : i32
    %c0_i32_1 = arith.constant 0 : i32
    return %c0_i32, %c0_i32_0 : i32, i32
  }
  func.func @transform_15(%arg0: i32) -> (i32, i32, i32) {
    %c0_i32 = arith.constant 0 : i32
    %c0_i32_0 = arith.constant 0 : i32
    %c0_i32_1 = arith.constant 0 : i32
    return %arg0, %c0_i32, %c0_i32_0 : i32, i32, i32
  }
}

</mosaic_0001>

<bundles_post_ra>
// kernel: transformer_forward.1
= control target key start
LH: loop header
LB: loop body
LE: loop exit
PB: predicated region body
PF: predicated region fallthrough
CT: control target
= control target key end

     0   :  { %s3384_s0 = inlined_call_operand.vmem [shape: f32[2,8,16], index: 0, kind: input, shape index: {}]   ;;  %s3385_s1 = inlined_call_operand.vmem [shape: f32[2,8,10], index: 1, kind: input, shape index: {}]   ;;  %s3386_s2 = inlined_call_operand.vmem [shape: f32[2,1,16], index: 2, kind: input, shape index: {}]   ;;  %s3387_s3 = inlined_call_operand.vmem [shape: f32[10,16], index: 3, kind: input, shape index: {}]   ;;  %s3388_s4 = inlined_call_operand.vmem [shape: f32[16,32], index: 4, kind: input, shape index: {}]   ;;  %s3389_s5 = inlined_call_operand.vmem [shape: f32[1,32], index: 5, kind: input, shape index: {}]   ;;  %s3390_s6 = inlined_call_operand.vmem [shape: f32[2,32,96], index: 6, kind: input, shape index: {}]   ;;  %s3391_s7 = inlined_call_operand.vmem [shape: f32[2,32,32], index: 7, kind: input, shape index: {}]   ;;  %s3392_s8 = inlined_call_operand.vmem [shape: f32[2,32,64], index: 8, kind: input, shape index: {}]   ;;  %s3393_s9 = inlined_call_operand.vmem [shape: f32[2,64,32], index: 9, kind: input, shape index: {}]   ;;  %s3394_s10 = inlined_call_operand.vmem [shape: f32[2,1,96], index: 10, kind: input, shape index: {}]   ;;  %s3395_s11 = inlined_call_operand.vmem [shape: f32[2,6,32], index: 11, kind: input, shape index: {}]   ;;  %s3396_s12 = inlined_call_operand.vmem [shape: f32[2,1,64], index: 12, kind: input, shape index: {}]   ;;  %s3397_s13 = inlined_call_operand.vmem [shape: f32[32,8], index: 13, kind: input, shape index: {}]   ;;  %s3398_s14 = inlined_call_operand.vmem [shape: f32[1,8], index: 14, kind: input, shape index: {}]   ;;  %s3399_s15 = inlined_call_operand.hbm [shape: f32[2,8,8], index: 15, kind: output, shape index: {}]  }
   0x1   :  { %3406 = sst [smem:[#allocation8_spill]] %s3385_s1 }
   0x2   :  { %3407 = sst [smem:[#allocation9_spill]] %s3387_s3 }
   0x3   :  { %3408 = sst [smem:[#allocation10_spill]] %s3388_s4 }
   0x4   :  { %20 = vsyncpa [#allocation3], 0 }
   0x5   :  { %22 = vsyncpa [#allocation3 + $0x1], 0  ;;  %s2931_s18 = smov 0   ;;  %s2933_s19 = smov 0  }
   0x6   :  { %s2935_s20 = smov 0   ;;  %s2937_s21 = smov 0  }
   0x7 LB: > { %3409 = sst [smem:[#allocation5_spill]] %s2836_s20  ;;  %s2952_s22 = sadd.s32 4294967295, %s2840_s21   ;;  %s2840_s21 = sphi %s2937_s21, %s3419_s21   ;;  %s2836_s20 = sphi %s2935_s20, %s3421_s20   ;;  %s2832_s19 = sphi %s2933_s19, %s3423_s19   ;;  %s2828_s18 = sphi %s2931_s18, %s3422_s18  }
   0x8   : > { %s2325_s23 = sadd.s32 4294967294, %s2840_s21   ;;  %s2956_s24 = sadd.s32 1, %s2840_s21  }
   0x9   : > { %3410 = sst [smem:[#allocation6_spill]] %s2956_s24  ;;  %s365_s25 = sadd.s32 1, %s2836_s20 }
   0xa   : > { %s362_s26 = ssub.s32 %s2840_s21, %s2956_s24  ;;  %p375_p0 = scmp.ne.s32.totalorder %s2836_s20, %s2832_s19 }
   0xb   : > { %p363_p1 = scmp.eq.s32.totalorder %s362_s26, 0  ;;  %p376_p2 = scmp.eq.s32.totalorder %s2952_s22, 1 }
   0xc   : > { %p381_p3 = scmp.ne.s32.totalorder %s2832_s19, %s2828_s18  ;;  %p382_p4 = scmp.eq.s32.totalorder %s2325_s23, 1 }
   0xd   : > { %s2967_s27 = scalar_select %p363_p1, %s2836_s20, %s365_s25  }
   0xe   : > { %p2969_p5 = por %p376_p2, %p375_p0  ;;  %p2973_p6 = por %p382_p4, %p381_p3 }
   0xf   : > { %3411 = sst [smem:[#allocation7_spill]] %s2967_s27  ;;  %p2328_p7 = scmp.ge.s32.totalorder %s2840_s21, 1 }
  0x10   : > { %p456_p8 = scmp.lt.s32.totalorder %s2840_s21, 3 }
  0x12   : > { %p457_p9 = pnand %p2328_p7, %p456_p8 }
  0x13   : > { %s3414_s3 = sld [smem:[#allocation9_spill]] (!%p457_p9)  ;;  %vm528_vm0 = vcmask (!%p457_p9), 1041408   ;;  %v2842_v2 = vmov (!%p457_p9), 0.0|0.0   ;;  %vm2843_vm1 = vmmov (!%p457_p9), 1   ;;  %p510_p10 = scmp.lt.s32.totalorder (!%p457_p9), %s2952_s22, 1  ;;  %vm2844_vm3 = vmmov (!%p457_p9), 0  }
  0x14   : > { %460 = sbr.rel (%p457_p9) target bundleno = 5844 (0x16d4), region = 80  ;;  %2634 = vmatprep.subr.bf16.mxu1 (!%p457_p9), %v2842_v2  ;;  %vm2636_vm2 = vmpackc.low (!%p457_p9), %vm528_vm0, %vm2843_vm1  ;;  %2641 = vmatprep.subr.bf16.mxu0 (!%p457_p9), %v2842_v2  ;;  %v2845_v4 = vmov (!%p457_p9), 0.0   ;;  %vm524_vm4 = vcmask (!%p457_p9), 80896   ;;  %s3415_s1 = sld [smem:[#allocation8_spill]] (!%p457_p9)  ;;  %v697_v9 = vld [vmem:[%s3390_s6] sm:$0xff] (!%p457_p9)  ;;  %v698_v10 = vld [vmem:[%s3390_s6 + $0x8] sm:$0xff] (!%p457_p9) }
  0x15   : > { %2469 = vmatprep.mubr.msk.f32.mxu1 (!%p457_p9), %vm2844_vm3, %v2845_v4  ;;  %2487 = vmatprep.mubr.msk.f32.mxu0 (!%p457_p9), %vm2844_vm3, %v2845_v4  ;;  %s3416_s4 = sld [smem:[#allocation10_spill]] (!%p457_p9)  ;;  %v2642_v11 = vpack.c.bf16 (!%p457_p9), %v698_v10, %v697_v9  ;;  %vm621_vm5 = vcmask (!%p457_p9), 130048   ;;  %v699_v18 = vld [vmem:[%s3390_s6 + $0x10] sm:$0xff] (!%p457_p9)  ;;  %v700_v19 = vld [vmem:[%s3390_s6 + $0x18] sm:$0xff] (!%p457_p9)  ;;  %v2335_v21 = vld [vmem:[%s3389_s5] ss:$0 sm:$0xff] (!%p457_p9) }
  0x16   : > { %v2645_v20 = vpack.c.bf16 (!%p457_p9), %v700_v19, %v699_v18  ;;  %vm707_vm6 = vcmask (!%p457_p9), 261120   ;;  %v2337_v25 = vld [vmem:[%s3394_s10] ss:$0 sm:$0xff] (!%p457_p9)  ;;  %s2847_s23 = smov (!%p457_p9), 96   ;;  %vm938_vm7 = vcmask (!%p457_p9), 64512   ;;  %v1119_v59 = vld [vmem:[%s3391_s7 + $0x8] sm:$0xff] (!%p457_p9) }
  0x17   : > { %2643 = vmatpush3.bf16.msra.mxu0 (!%p457_p9), %v2642_v11  ;;  %v1118_v58 = vld [vmem:[%s3391_s7] sm:$0xff] (!%p457_p9)  ;;  %v1120_v60 = vld [vmem:[%s3391_s7 + $0x10] sm:$0xff] (!%p457_p9)  ;;  %v1121_v62 = vld [vmem:[%s3391_s7 + $0x18] sm:$0xff] (!%p457_p9)  ;;  %vm1321_vm8 = vcmask (!%p457_p9), 523264   ;;  %s2387_s27 = sshll.u32 (!%p457_p9), %s2952_s22, 7 }
  0x18   : > { %2644 = vmatprep.subr.bf16.mxu0 (!%p457_p9), %v2842_v2  ;;  %v2648_v61 = vpack.c.bf16 (!%p457_p9), %v1119_v59, %v1118_v58  ;;  %v2651_v63 = vpack.c.bf16 (!%p457_p9), %v1121_v62, %v1120_v60  ;;  %v3093_v11 = vld [vmem:[%s3395_s11] sm:$0x3f] (!%p457_p9) }
  0x19   : > { %v522_v0 = vld [vmem:[%s3414_s3] sm:$0xff] (!%p457_p9)  ;;  %v523_v1 = vld [vmem:[%s3414_s3 + $0x8] sm:$0x3] (!%p457_p9)  ;;  %s2846_s3 = smov (!%p457_p9), 112  }
  0x1a   : > { %v2635_v3 = vpack.c.bf16 (!%p457_p9), %v523_v1, %v522_v0 }
  0x1b   : > { %s511_s25 = scalar_select %p510_p10, %s2952_s22, 1  ;;  %v612_v6 = vld [vmem:[%s3416_s4] sm:$0xff]  ;;  %v613_v7 = vld [vmem:[%s3416_s4 + $0x8] sm:$0xff]  ;;  %2646 = vmatpush3.bf16.msra.mxu0 %v2645_v20 }
  0x1c   : > { %2637 = vmatpush3.bf16.msk.msra.mxu1 %vm2636_vm2, %v2635_v3  ;;  %v2639_v8 = vpack.c.bf16 %v613_v7, %v612_v6  ;;  %2500 = vmatprep.subr.mxu0 %v2845_v4  ;;  %s2850_s22 = smov [#allocation2]  }
  0x1d   : > { %2638 = vmatprep.subr.bf16.mxu1 %v2842_v2  ;;  %s2330_s26 = sshll.u32 %s511_s25, 3  ;;  %s520_s4 = scalar_lea.vmem %s3386_s2, %s511_s25 }
  0x1e   : > { %s517_s17 = scalar_lea.vmem %s3415_s1, %s2330_s26  ;;  %s513_s20 = scalar_lea.vmem %s3384_s0, %s2330_s26  ;;  %v2334_v14 = vld [vmem:[%s520_s4] ss:$0 sm:$0xff] }
  0x1f   : > { %v521_v5 = vld [vmem:[%s517_s17] sm:$0xff]  ;;  %s3403_s17 = smov 16   ;;  %s3418_s1 = smov 16  }
  0x20   : > { %2470 = vmatmul.mubr.msk.f32.vlgmr.msra.gmra.mrb[0].mxu1 %vm524_vm4, %v521_v5  ;;  %v602_v12 = vld [vmem:[%s513_s20] sm:$0xff]  ;;  %s3404_s20 = smov 64   ;;  %s507_s4 = sand.u32 1, %s2832_s19  }
  0x21   : > { %2476 = vmatprep.mubr.msk.f32.mxu1 %vm2844_vm3, %v2845_v4  ;;  %2640 = vmatpush3.bf16.msra.mxu1 %v2639_v8  ;;  %v1122_v8 = vlaneseq  ;;  %s2329_s25 = sshll.u32 %s507_s4, 3  ;;  %s2232_s16 = scalar_lea.sflag [#allocation3], %s507_s4 }
  0x22   : > { %2490 = vmatprep.subr.mxu1 %v2845_v4  ;;  %s509_s24 = scalar_lea.vmem [#allocation2], %s2329_s25  ;;  %s2782_s25 = sshll.u32 %s2850_s22, 4  ;;  %s2783_s25 = int_to_ptr.vmem [resolvable:$false] %s2782_s25 }
  0x23   : > { %v3087_v9 = vshrl.u32 %v1122_v8, 7  ;;  %v2352_v8 = vld [vmem:[%s3390_s6 + $0x28] sm:$0xff]  ;;  %s2245_s30 = sshll.u32 %s509_s24, 4  ;;  %s3343_s30 = int_to_ptr.vmem [resolvable:$true] %s2245_s30 }
  0x24   : > { %p2785_p0 = scmp.lt.s32.totalorder %s3343_s30, %s2783_s25 }
  0x25   : > { %v1124_v10 = vsub.s32 0, %v3087_v9 }
  0xf3   : > { %v598_v13 = vpop.f32.mrb[0].mxu1 }
  0xf4   : > { %v603_v15 = vadd.f32 %v602_v12, %v598_v13  ;;  %v2471_v16 = vpop.f32.mrb[1].mxu1  ;;  %v1125_v12 = vrot.slane %v3093_v11, %v1124_v10 }
  0xf6   : > { %v611_v17 = vadd.f32 %v2334_v14, %v603_v15 }
  0xf8   : > { %2477 = vmatmul.mubr.msk.f32.vlgmr.msra.gmra.mrb[2].mxu1 %vm621_vm5, %v611_v17 }
  0xf9   : > { %2492 = vmatprep.mubr.msk.f32.mxu1 %vm2844_vm3, %v2845_v4 }
 0x1cb   : > { %v691_v22 = vpop.f32.mrb[2].mxu1 }
 0x1cc   : > { %v3032_v23 = vadd.f32 %v2335_v21, %v691_v22  ;;  %v2478_v24 = vpop.f32.mrb[3].mxu1 }
 0x1cd   : > { %v1224_v24 = vld [vmem:[%s3392_s8] sm:$0xff] }
 0x1ce   : > { %2488 = vmatmul.mubr.msk.f32.vlgmr.msra.gmra.mrb[0].mxu0 %vm707_vm6, %v3032_v23 }
 0x1cf   : > { %2502 = vmatprep.mubr.msk.f32.mxu0 %vm2844_vm3, %v2845_v4 }
 0x2a1   : > { %v777_v26 = vpop.f32.mrb[0].mxu0 }
 0x2a2   : > { %v778_v27 = vadd.f32 %v2337_v25, %v777_v26  ;;  %v2489_v28 = vpop.f32.mrb[1].mxu0  ;;  %v1225_v25 = vld [vmem:[%s3392_s8 + $0x8] sm:$0xff] }
 0x2a3   : > { %v2654_v26 = vpack.c.bf16 %v1225_v25, %v1224_v24 }
 0x2a4   : > { %782 = vrot.lane.b32.xlu0 %v778_v27, %s2846_s3 }
 0x2a8   : > { %784 = vrot.lane.b32.xlu0 %v778_v27, %s2847_s23 }
 0x316   : > { %v783_v29 = vpop.permute.xlu0 %782 }
 0x317   : > { %860 = vrot.lane.b32.xlu1 %v783_v29, %s2847_s23 }
 0x31a   : > { %v785_v30 = vpop.permute.xlu0 %784 }
 0x31b   : > { %2491 = vmatpush3.xpose.msk.msra.mxu1 %vm621_vm5, %v785_v30  ;;  %v1310_v30 = vld [vmem:[%s3393_s9 + $0x8] sm:$0xff] }
 0x31c   : > { %2495 = vmatprep.subr.mxu1 %v2845_v4 }
 0x31e   : > { %2493 = vmatmul.mubr.msk.f32.vlgmr.msra.gmra.mrb[4].mxu1 %vm621_vm5, %v778_v27 }
 0x31f   : > { %2497 = vmatprep.mubr.msk.f32.mxu1 %vm2844_vm3, %v2845_v4 }
 0x389   : > { %v861_v31 = vpop.permute.xlu1 %860 }
 0x38a   : > { %2496 = vmatpush3.xpose.msk.msra.mxu1 %vm621_vm5, %v861_v31  ;;  %v1311_v31 = vld [vmem:[%s3393_s9 + $0x10] sm:$0xff] }
 0x38b   : > { %2505 = vmatprep.subr.mxu1 %v2845_v4 }
 0x38d   : > { %2498 = vmatmul.mubr.msk.f32.vlgmr.msra.gmra.mrb[6].mxu1 %vm621_vm5, %v783_v29 }
 0x38e   : > { %2507 = vmatprep.mubr.msk.f32.mxu1 %vm2844_vm3, %v2845_v4 }
 0x3f1   : > { %v856_v32 = vpop.f32.mrb[4].mxu1 }
 0x3f2   : > { %v936_v33 = vmul.f32 0.25, %v856_v32  ;;  %v2494_v34 = vpop.f32.mrb[5].mxu1 }
 0x3f4   : > { %v939_v35 = vsel %vm938_vm7, %v936_v33, -inf }
 0x3f5   : > { %940 = vmax.xlane.f32.xlu0 %v939_v35  ;;  %v1313_v35 = vld [vmem:[%s3393_s9 + $0x20] sm:$0xff] }
 0x460   : > { %v932_v36 = vpop.f32.mrb[6].mxu1 }
 0x461   : > { %v937_v37 = vmul.f32 0.25, %v932_v36  ;;  %v2499_v38 = vpop.f32.mrb[7].mxu1  ;;  %v1314_v36 = vld [vmem:[%s3393_s9 + $0x28] sm:$0xff] }
 0x463   : > { %v942_v39 = vsel %vm938_vm7, %v937_v37, -inf }
 0x464   : > { %943 = vmax.xlane.f32.xlu1 %v942_v39 }
 0x475   : > { %1037 = vrot.lane.b32.xlu1 %v783_v29, %s3404_s20  ;;  %v1309_v29 = vld [vmem:[%s3393_s9] sm:$0xff] }
 0x476   : > { %v2660_v32 = vpack.c.bf16 %v1310_v30, %v1309_v29 }
 0x482   : > { %v941_v40 = vpop.xlane.xlu0 %940 }
 0x483   : > { %v945_v41 = vsub.f32 %v936_v33, %v941_v40  ;;  %v1312_v33 = vld [vmem:[%s3393_s9 + $0x18] sm:$0xff] }
 0x484   : > { %v2663_v34 = vpack.c.bf16 %v1312_v33, %v1311_v31 }
 0x485   : > { %v947_v44 = vmul.f32 1.442695, %v945_v41  ;;  %v1216_v41 = vsub.s32 1, %v3087_v9 }
 0x4f1   : > { %v944_v42 = vpop.xlane.xlu1 %943 }
 0x4f2   : > { %v946_v43 = vsub.f32 %v937_v37, %v944_v42  ;;  %v2666_v37 = vpack.c.bf16 %v1314_v36, %v1313_v35  ;;  %v1221_v42 = vsub.s32 2, %v3087_v9 }
 0x4f4   : > { %v949_v45 = vmul.f32 1.442695, %v946_v43  ;;  %v1217_v43 = vrot.slane %v3093_v11, %v1216_v41 }
 0x4f5   : > { %v1038_v46 = vpop.permute.xlu1 %1037 }
 0x4f6   : > { %2754 = vpow2.f32 %v949_v45  ;;  %2506 = vmatpush3.msra.mxu1 %v1038_v46  ;;  %v1222_v46 = vrot.slane %v3093_v11, %v1221_v42 }
 0x4f7   : > { %2653 = vmatprep.subr.bf16.mxu1 %v2842_v2  ;;  %2756 = vpow2.f32 %v947_v44 }
 0x500   : > { %v2755_v47 = vpop.eup %2754 }
 0x501   : > { %v954_v48 = vsel %vm938_vm7, %v2755_v47, 0.0  ;;  %v2757_v49 = vpop.eup %2756 }
 0x502   : > { %955 = vadd.xlane.f32.xlu0 %v954_v48  ;;  %v951_v50 = vsel %vm938_vm7, %v2757_v49, 0.0 }
 0x506   : > { %952 = vadd.xlane.f32.xlu0 %v951_v50  ;;  %v1316_v50 = vld [vmem:[%s3393_s9 + $0x38] sm:$0xff] }
 0x51c   : > { %961 = vrot.lane.b32.xlu0 %v778_v27, %s3404_s20  ;;  %v1227_v27 = vld [vmem:[%s3392_s8 + $0x18] sm:$0xff] }
 0x58f   : > { %v956_v51 = vpop.xlane.xlu0 %955 }
 0x590   : > { %2758 = vrcp.f32 %v956_v51 }
 0x593   : > { %v953_v52 = vpop.xlane.xlu0 %952 }
 0x594   : > { %2760 = vrcp.f32 %v953_v52  ;;  %v2346_v52 = vld [vmem:[%s3396_s12] ss:$0 sm:$0xff] }
 0x597   : > { %v962_v53 = vpop.permute.xlu0 %961 }
 0x598   : > { %2501 = vmatpush3.msra.mxu0 %v962_v53 }
 0x599   : > { %2647 = vmatprep.subr.bf16.mxu0 %v2842_v2 }
 0x59a   : > { %v2759_v54 = vpop.eup %2758 }
 0x59b   : > { %v960_v55 = vmul.f32 %v2759_v54, %v2755_v47 }
 0x59d   : > { %2508 = vmatmul.mubr.msk.f32.vlgmr.msra.gmra.mrb[8].mxu1 %vm938_vm7, %v960_v55 }
 0x59e   : > { %v2761_v56 = vpop.eup %2760  ;;  %2529 = vmatprep.mubr.msk.f32.mxu1 %vm2844_vm3, %v2845_v4  ;;  %2655 = vmatpush3.bf16.msra.mxu1 %v2654_v26 }
 0x59f   : > { %v959_v57 = vmul.f32 %v2761_v56, %v2757_v49  ;;  %2656 = vmatprep.subr.bf16.mxu1 %v2842_v2  ;;  %v1315_v49 = vld [vmem:[%s3393_s9 + $0x30] sm:$0xff] }
 0x5a0   : > { %v2669_v51 = vpack.c.bf16 %v1316_v50, %v1315_v49 }
 0x5a1   : > { %2503 = vmatmul.mubr.msk.f32.vlgmr.msra.gmra.mrb[2].mxu0 %vm938_vm7, %v959_v57  ;;  %v1319_v57 = vsub.s32 3, %v3087_v9 }
 0x5a2   : > { %2518 = vmatprep.mubr.msk.f32.mxu0 %vm2844_vm3, %v2845_v4  ;;  %2649 = vmatpush3.bf16.msra.mxu0 %v2648_v61 }
 0x5a3   : > { %2650 = vmatprep.subr.bf16.mxu0 %v2842_v2  ;;  %v1320_v58 = vrot.slane %v3093_v11, %v1319_v57 }
 0x5a6   : > { %2652 = vmatpush3.bf16.msra.mxu0 %v2651_v63 }
 0x5a7   : > { %2659 = vmatprep.subr.bf16.mxu0 %v2842_v2 }
 0x670   : > { %v1109_v0 = vpop.f32.mrb[8].mxu1 }
 0x671   : > { %1114 = vrot.lane.b32.xlu1 %v1109_v0, %s3403_s17  ;;  %v2509_v1 = vpop.f32.mrb[9].mxu1  ;;  %s3341_s17 = scalar_lea.hbm %s3399_s15, %s2387_s27 }
 0x674   : > { %v1033_v3 = vpop.f32.mrb[2].mxu0 }
 0x675   : > { %v2504_v5 = vpop.f32.mrb[3].mxu0 }
 0x6e3   : > { %v1115_v6 = vpop.permute.xlu1 %1114 }
 0x6e4   : > { %v1117_v7 = vsel %vm621_vm5, %v1033_v3, %v1115_v6 }
 0x6e5   : > { %2519 = vmatmul.mubr.msk.f32.vlgmr.msra.gmra.mrb[4].mxu0 %vm707_vm6, %v1117_v7  ;;  %v2351_v7 = vld [vmem:[%s3390_s6 + $0x20] sm:$0xff] }
 0x6e6   : > { %2548 = vmatprep.mubr.msk.f32.mxu0 %vm2844_vm3, %v2845_v4  ;;  %2661 = vmatpush3.bf16.msra.mxu0 %v2660_v32 }
 0x6e7   : > { %2662 = vmatprep.subr.bf16.mxu0 %v2842_v2 }
 0x6ea   : > { %2664 = vmatpush3.bf16.msra.mxu0 %v2663_v34 }
 0x6eb   : > { %2665 = vmatprep.subr.bf16.mxu0 %v2842_v2 }
 0x6ee   : > { %2667 = vmatpush3.bf16.msra.mxu0 %v2666_v37 }
 0x6ef   : > { %2668 = vmatprep.subr.bf16.mxu0 %v2842_v2 }
 0x6f2   : > { %2670 = vmatpush3.bf16.msra.mxu0 %v2669_v51 }
 0x6f3   : > { %2572 = vmatprep.subr.mxu0 %v2845_v4 }
 0x7b8   : > { %v1195_v13 = vpop.f32.mrb[4].mxu0 }
 0x7b9   : > { %v1196_v14 = vadd.f32 %v1195_v13, %v1125_v12  ;;  %v2520_v15 = vpop.f32.mrb[5].mxu0  ;;  %v2672_v12 = vpack.c.bf16 %v2352_v8, %v2351_v7  ;;  %v2353_v13 = vld [vmem:[%s3390_s6 + $0x30] sm:$0xff] }
 0x7bb   : > { %v1199_v16 = vadd.f32 %v1196_v14, %v3032_v23  ;;  %v1226_v23 = vld [vmem:[%s3392_s8 + $0x10] sm:$0xff]  ;;  %v2354_v14 = vld [vmem:[%s3390_s6 + $0x38] sm:$0xff] }
 0x7bc   : > { %v2657_v28 = vpack.c.bf16 %v1227_v27, %v1226_v23  ;;  %v2675_v15 = vpack.c.bf16 %v2354_v14, %v2353_v13  ;;  %v2355_v27 = vld [vmem:[%s3394_s10 + $0x1] ss:$0 sm:$0xff] }
 0x7bd   : > { %v1200_v17 = vsel %vm707_vm6, %v1199_v16, 0.0 }
 0x7be   : > { %1201 = vadd.xlane.f32.xlu1 %v1200_v17  ;;  %2658 = vmatpush3.bf16.msra.mxu1 %v2657_v28 }
 0x7bf   : > { %2671 = vmatprep.subr.bf16.mxu1 %v2842_v2 }
 0x84b   : > { %v1202_v18 = vpop.xlane.xlu1 %1201 }
 0x84c   : > { %v1204_v19 = vmul.f32 0.03125, %v1202_v18 }
 0x84e   : > { %v1205_v20 = vsub.f32 %v1199_v16, %v1204_v19  ;;  %v1411_v19 = vsub.s32 4, %v3087_v9 }
 0x850   : > { %v1206_v21 = vmul.f32 %v1205_v20, %v1205_v20 }
 0x852   : > { %v1207_v22 = vsel %vm707_vm6, %v1206_v21, 0.0  ;;  %v1412_v21 = vrot.slane %v3093_v11, %v1411_v19 }
 0x853   : > { %1208 = vadd.xlane.f32.xlu0 %v1207_v22 }
 0x8e0   : > { %v1209_v38 = vpop.xlane.xlu0 %1208 }
 0x8e1   : > { %v1210_v39 = vmul.f32 0.03125, %v1209_v38 }
 0x8e3   : > { %v1211_v40 = vadd.f32 1e-05, %v1210_v39 }
 0x8e5   : > { %2762 = vrsqrt.f32 %v1211_v40 }
 0x8ef   : > { %v2763_v44 = vpop.eup %2762 }
 0x8f0   : > { %v1213_v45 = vmul.f32 %v2763_v44, %v1205_v20  ;;  %v1416_v20 = vsub.s32 5, %v3087_v9 }
 0x8f2   : > { %v1218_v47 = vmul.f32 %v1217_v43, %v1213_v45  ;;  %v1417_v25 = vrot.slane %v3093_v11, %v1416_v20 }
 0x8f4   : > { %v1223_v48 = vadd.f32 %v1222_v46, %v1218_v47 }
 0x8f6   : > { %2530 = vmatmul.mubr.msk.f32.vlgmr.msra.gmra.mrb[10].mxu1 %vm707_vm6, %v1223_v48 }
 0x8f7   : > { %2559 = vmatprep.mubr.msk.f32.mxu1 %vm2844_vm3, %v2845_v4  ;;  %2673 = vmatpush3.bf16.msra.mxu1 %v2672_v12 }
 0x8f8   : > { %2674 = vmatprep.subr.bf16.mxu1 %v2842_v2 }
 0x8fb   : > { %2676 = vmatpush3.bf16.msra.mxu1 %v2675_v15  ;;  %v3246_v15 = vld [vmem:[%s3395_s11 + $0x8] sm:$0x3f] }
 0x8fc   : > { %2562 = vmatprep.subr.mxu1 %v2845_v4 }
 0x9c9   : > { %v1304_v53 = vpop.f32.mrb[10].mxu1 }
 0x9ca   : > { %v1305_v54 = vadd.f32 %v2346_v52, %v1304_v53  ;;  %v2531_v55 = vpop.f32.mrb[11].mxu1 }
 0x9cc   : > { %v1308_v56 = vmax.f32 %v1305_v54, 0.0 }
 0x9ce   : > { %2549 = vmatmul.mubr.msk.f32.vlgmr.msra.gmra.mrb[6].mxu0 %vm1321_vm8, %v1308_v56 }
 0x9cf   : > { %2574 = vmatprep.mubr.msk.f32.mxu0 %vm2844_vm3, %v2845_v4 }
 0xaa1   : > { %v1391_v59 = vpop.f32.mrb[6].mxu0 }
 0xaa2   : > { %v1392_v60 = vadd.f32 %v1391_v59, %v1320_v58  ;;  %v2550_v61 = vpop.f32.mrb[7].mxu0 }
 0xaa4   : > { %v1395_v62 = vadd.f32 %v1392_v60, %v1223_v48 }
 0xaa6   : > { %v1396_v63 = vsel %vm707_vm6, %v1395_v62, 0.0 }
 0xaa7   : > { %1397 = vadd.xlane.f32.xlu1 %v1396_v63  ;;  %v2364_v63 = vld [vmem:[%s3391_s7 + $0x28] sm:$0xff] }
 0xb34   : > { %v1398_v0 = vpop.xlane.xlu1 %1397 }
 0xb35   : > { %v1399_v1 = vmul.f32 0.03125, %v1398_v0  ;;  %v2365_v0 = vld [vmem:[%s3391_s7 + $0x30] sm:$0xff] }
 0xb37   : > { %v1400_v3 = vsub.f32 %v1395_v62, %v1399_v1  ;;  %v2363_v62 = vld [vmem:[%s3391_s7 + $0x20] sm:$0xff] }
 0xb38   : > { %v2678_v1 = vpack.c.bf16 %v2364_v63, %v2363_v62 }
 0xb39   : > { %v1401_v5 = vmul.f32 %v1400_v3, %v1400_v3 }
 0xb3b   : > { %v1402_v6 = vsel %vm707_vm6, %v1401_v5, 0.0 }
 0xb3c   : > { %1403 = vadd.xlane.f32.xlu0 %v1402_v6 }
 0xbc9   : > { %v1404_v16 = vpop.xlane.xlu0 %1403 }
 0xbca   : > { %v1405_v17 = vmul.f32 0.03125, %v1404_v16  ;;  %v1851_v16 = vrot.slane %v3246_v15, %v1124_v10  ;;  %v2369_v10 = vld [vmem:[%s3392_s8 + $0x28] sm:$0xff] }
 0xbcc   : > { %v1406_v18 = vadd.f32 1e-05, %v1405_v17 }
 0xbce   : > { %2764 = vrsqrt.f32 %v1406_v18 }
 0xbd8   : > { %v2765_v22 = vpop.eup %2764 }
 0xbd9   : > { %v1408_v24 = vmul.f32 %v2765_v22, %v1400_v3  ;;  %v2366_v3 = vld [vmem:[%s3391_s7 + $0x38] sm:$0xff] }
 0xbda   : > { %v2681_v5 = vpack.c.bf16 %v2366_v3, %v2365_v0 }
 0xbdb   : > { %v1413_v26 = vmul.f32 %v1412_v21, %v1408_v24 }
 0xbdd   : > { %v3188_v23 = vadd.f32 %v1417_v25, %v1413_v26 }
 0xbdf   : > { %2560 = vmatmul.mubr.msk.f32.vlgmr.msra.gmra.mrb[12].mxu1 %vm707_vm6, %v3188_v23 }
 0xbe0   : > { %2564 = vmatprep.mubr.msk.f32.mxu1 %vm2844_vm3, %v2845_v4 }
 0xcb2   : > { %v1503_v28 = vpop.f32.mrb[12].mxu1 }
 0xcb3   : > { %v1504_v29 = vadd.f32 %v2355_v27, %v1503_v28  ;;  %v2561_v30 = vpop.f32.mrb[13].mxu1 }
 0xcb4   : > { %v2368_v30 = vld [vmem:[%s3392_s8 + $0x20] sm:$0xff] }
 0xcb5   : > { %1510 = vrot.lane.b32.xlu0 %v1504_v29, %s2847_s23  ;;  %1508 = vrot.lane.b32.xlu1 %v1504_v29, %s2846_s3  ;;  %s3417_s3 = smov 64  }
 0xd27   : > { %v1511_v11 = vpop.permute.xlu0 %1510  ;;  %v1509_v31 = vpop.permute.xlu1 %1508 }
 0xd28   : > { %2563 = vmatpush3.xpose.msk.msra.mxu1 %vm621_vm5, %v1511_v11  ;;  %1586 = vrot.lane.b32.xlu1 %v1509_v31, %s2847_s23  ;;  %v2684_v11 = vpack.c.bf16 %v2369_v10, %v2368_v30 }
 0xd29   : > { %2567 = vmatprep.subr.mxu1 %v2845_v4 }
 0xd2b   : > { %2565 = vmatmul.mubr.msk.f32.vlgmr.msra.gmra.mrb[14].mxu1 %vm621_vm5, %v1504_v29 }
 0xd2c   : > { %2569 = vmatprep.mubr.msk.f32.mxu1 %vm2844_vm3, %v2845_v4 }
 0xd9a   : > { %v1587_v32 = vpop.permute.xlu1 %1586 }
 0xd9b   : > { %2568 = vmatpush3.xpose.msk.msra.mxu1 %vm621_vm5, %v1587_v32 }
 0xd9c   : > { %2577 = vmatprep.subr.mxu1 %v2845_v4 }
 0xd9e   : > { %2570 = vmatmul.mubr.msk.f32.vlgmr.msra.gmra.mrb[16].mxu1 %vm621_vm5, %v1509_v31 }
 0xd9f   : > { %2579 = vmatprep.mubr.msk.f32.mxu1 %vm2844_vm3, %v2845_v4 }
 0xdfe   : > { %v1582_v33 = vpop.f32.mrb[14].mxu1 }
 0xdff   : > { %v1662_v34 = vmul.f32 0.25, %v1582_v33  ;;  %v2566_v35 = vpop.f32.mrb[15].mxu1  ;;  %v2375_v33 = vld [vmem:[%s3393_s9 + $0x40] sm:$0xff] }
 0xe00   : > { %v2377_v35 = vld [vmem:[%s3393_s9 + $0x50] sm:$0xff] }
 0xe01   : > { %v1664_v36 = vsel %vm938_vm7, %v1662_v34, -inf }
 0xe02   : > { %1665 = vmax.xlane.f32.xlu0 %v1664_v36 }
 0xe71   : > { %v1658_v37 = vpop.f32.mrb[16].mxu1 }
 0xe72   : > { %v1663_v38 = vmul.f32 0.25, %v1658_v37  ;;  %v2571_v39 = vpop.f32.mrb[17].mxu1  ;;  %v2378_v37 = vld [vmem:[%s3393_s9 + $0x58] sm:$0xff] }
 0xe73   : > { %v2379_v39 = vld [vmem:[%s3393_s9 + $0x60] sm:$0xff] }
 0xe74   : > { %v1667_v40 = vsel %vm938_vm7, %v1663_v38, -inf }
 0xe75   : > { %1668 = vmax.xlane.f32.xlu1 %v1667_v40  ;;  %v2380_v40 = vld [vmem:[%s3393_s9 + $0x68] sm:$0xff] }
 0xe86   : > { %1762 = vrot.lane.b32.xlu1 %v1509_v31, %s3417_s3  ;;  %v2371_v31 = vld [vmem:[%s3392_s8 + $0x38] sm:$0xff] }
 0xe8f   : > { %v1666_v43 = vpop.xlane.xlu0 %1665 }
 0xe90   : > { %v1670_v44 = vsub.f32 %v1662_v34, %v1666_v43  ;;  %v2376_v34 = vld [vmem:[%s3393_s9 + $0x48] sm:$0xff]  ;;  %v2696_v43 = vpack.c.bf16 %v2380_v40, %v2379_v39 }
 0xe91   : > { %v2690_v36 = vpack.c.bf16 %v2376_v34, %v2375_v33 }
 0xe92   : > { %v1672_v47 = vmul.f32 1.442695, %v1670_v44 }
 0xf02   : > { %v1669_v45 = vpop.xlane.xlu1 %1668 }
 0xf03   : > { %v1671_v46 = vsub.f32 %v1663_v38, %v1669_v45  ;;  %v2693_v38 = vpack.c.bf16 %v2378_v37, %v2377_v35 }
 0xf05   : > { %v1674_v48 = vmul.f32 1.442695, %v1671_v46 }
 0xf06   : > { %v1763_v49 = vpop.permute.xlu1 %1762 }
 0xf07   : > { %2766 = vpow2.f32 %v1674_v48  ;;  %2578 = vmatpush3.msra.mxu1 %v1763_v49 }
 0xf08   : > { %2683 = vmatprep.subr.bf16.mxu1 %v2842_v2  ;;  %2768 = vpow2.f32 %v1672_v47  ;;  %v1942_v47 = vrot.slane %v3246_v15, %v1216_v41  ;;  %v2382_v41 = vld [vmem:[%s3393_s9 + $0x78] sm:$0xff] }
 0xf11   : > { %v2767_v50 = vpop.eup %2766 }
 0xf12   : > { %v1679_v51 = vsel %vm938_vm7, %v2767_v50, 0.0  ;;  %v2769_v52 = vpop.eup %2768 }
 0xf13   : > { %1680 = vadd.xlane.f32.xlu0 %v1679_v51  ;;  %v1676_v53 = vsel %vm938_vm7, %v2769_v52, 0.0 }
 0xf17   : > { %1677 = vadd.xlane.f32.xlu0 %v1676_v53  ;;  %v2381_v53 = vld [vmem:[%s3393_s9 + $0x70] sm:$0xff] }
 0xf2d   : > { %1686 = vrot.lane.b32.xlu0 %v1504_v29, %s3417_s3  ;;  %s2784_s3 = scalar_lea.vmem %s2783_s25, 256 }
 0xfa0   : > { %v1681_v54 = vpop.xlane.xlu0 %1680 }
 0xfa1   : > { %2770 = vrcp.f32 %v1681_v54  ;;  %v2699_v54 = vpack.c.bf16 %v2382_v41, %v2381_v53 }
 0xfa4   : > { %v1678_v55 = vpop.xlane.xlu0 %1677 }
 0xfa5   : > { %2772 = vrcp.f32 %v1678_v55 }
 0xfa8   : > { %v1687_v56 = vpop.permute.xlu0 %1686 }
 0xfa9   : > { %2573 = vmatpush3.msra.mxu0 %v1687_v56 }
 0xfaa   : > { %2677 = vmatprep.subr.bf16.mxu0 %v2842_v2 }
 0xfab   : > { %v2771_v58 = vpop.eup %2770 }
 0xfac   : > { %v1685_v59 = vmul.f32 %v2771_v58, %v2767_v50  ;;  %v1947_v50 = vrot.slane %v3246_v15, %v1221_v42  ;;  %v2373_v42 = vld [vmem:[%s3396_s12 + $0x1] ss:$0 sm:$0xff] }
 0xfae   : > { %2580 = vmatmul.mubr.msk.f32.vlgmr.msra.gmra.mrb[18].mxu1 %vm938_vm7, %v1685_v59 }
 0xfaf   : > { %v2773_v60 = vpop.eup %2772  ;;  %2601 = vmatprep.mubr.msk.f32.mxu1 %vm2844_vm3, %v2845_v4  ;;  %2685 = vmatpush3.bf16.msra.mxu1 %v2684_v11 }
 0xfb0   : > { %v1684_v61 = vmul.f32 %v2773_v60, %v2769_v52  ;;  %2686 = vmatprep.subr.bf16.mxu1 %v2842_v2 }
 0xfb2   : > { %2575 = vmatmul.mubr.msk.f32.vlgmr.msra.gmra.mrb[8].mxu0 %vm938_vm7, %v1684_v61 }
 0xfb3   : > { %2590 = vmatprep.mubr.msk.f32.mxu0 %vm2844_vm3, %v2845_v4  ;;  %2679 = vmatpush3.bf16.msra.mxu0 %v2678_v1 }
 0xfb4   : > { %2680 = vmatprep.subr.bf16.mxu0 %v2842_v2 }
 0xfb7   : > { %2682 = vmatpush3.bf16.msra.mxu0 %v2681_v5 }
 0xfb8   : > { %2689 = vmatprep.subr.bf16.mxu0 %v2842_v2 }
0x1081   : > { %v1834_v6 = vpop.f32.mrb[18].mxu1 }
0x1082   : > { %1839 = vrot.lane.b32.xlu1 %v1834_v6, %s3418_s1  ;;  %v2581_v7 = vpop.f32.mrb[19].mxu1  ;;  %s2778_s1 = scalar_lea.vmem %s3343_s30, 128 }
0x1083   : > { %p2779_p11 = scmp.ne.s32.totalorder %s3343_s30, %s2778_s1  ;;  %p2786_p1 = scmp.lt.s32.totalorder %s2784_s3, %s2778_s1 }
0x1085   : > { %v1758_v8 = vpop.f32.mrb[8].mxu0  ;;  %p2780_p12 = pnand %p2779_p11, %p2969_p5  ;;  %p2787_p2 = por %p2786_p1, %p2785_p0 }
0x1086   : > { %v2576_v12 = vpop.f32.mrb[9].mxu0 }
0x1087   : > { %p2781_p13 = pneg %p2780_p12 }
0x1089   : > { %p2788_p3 = pnand %p2787_p2, %p2781_p13 }
0x10f4   : > { %v1840_v13 = vpop.permute.xlu1 %1839 }
0x10f5   : > { %v1842_v14 = vsel %vm621_vm5, %v1758_v8, %v1840_v13  ;;  %v2146_v8 = vld [vmem:[%s3397_s13] sm:$0xff]  ;;  %v2148_v13 = vld [vmem:[%s3397_s13 + $0x10] sm:$0xff] }
0x10f6   : > { %2591 = vmatmul.mubr.msk.f32.vlgmr.msra.gmra.mrb[10].mxu0 %vm707_vm6, %v1842_v14  ;;  %v2149_v14 = vld [vmem:[%s3397_s13 + $0x18] sm:$0xff] }
0x10f7   : > { %2620 = vmatprep.mubr.msk.f32.mxu0 %vm2844_vm3, %v2845_v4  ;;  %2691 = vmatpush3.bf16.msra.mxu0 %v2690_v36 }
0x10f8   : > { %2692 = vmatprep.subr.bf16.mxu0 %v2842_v2 }
0x10fb   : > { %2694 = vmatpush3.bf16.msra.mxu0 %v2693_v38 }
0x10fc   : > { %2695 = vmatprep.subr.bf16.mxu0 %v2842_v2 }
0x10ff   : > { %2697 = vmatpush3.bf16.msra.mxu0 %v2696_v43 }
0x1100   : > { %2698 = vmatprep.subr.bf16.mxu0 %v2842_v2 }
0x1103   : > { %2700 = vmatpush3.bf16.msra.mxu0 %v2699_v54 }
0x11c9   : > { %v1921_v17 = vpop.f32.mrb[10].mxu0 }
0x11ca   : > { %v1922_v18 = vadd.f32 %v1921_v17, %v1851_v16  ;;  %v2592_v21 = vpop.f32.mrb[11].mxu0  ;;  %v2705_v16 = vpack.c.bf16 %v2149_v14, %v2148_v13 }
0x11cc   : > { %v1925_v22 = vadd.f32 %v1922_v18, %v3188_v23  ;;  %v2370_v23 = vld [vmem:[%s3392_s8 + $0x30] sm:$0xff] }
0x11cd   : > { %v2687_v32 = vpack.c.bf16 %v2371_v31, %v2370_v23 }
0x11ce   : > { %v1926_v24 = vsel %vm707_vm6, %v1925_v22, 0.0 }
0x11cf   : > { %1927 = vadd.xlane.f32.xlu1 %v1926_v24  ;;  %2688 = vmatpush3.bf16.msra.mxu1 %v2687_v32 }
0x11d0   : > { %2701 = vmatprep.subr.bf16.mxu1 %v2842_v2 }
0x125c   : > { %v1928_v25 = vpop.xlane.xlu1 %1927 }
0x125d   : > { %v1929_v26 = vmul.f32 0.03125, %v1928_v25  ;;  %v2144_v25 = vrot.slane %v3246_v15, %v1416_v20 }
0x125f   : > { %v1930_v27 = vsub.f32 %v1925_v22, %v1929_v26 }
0x1261   : > { %v1931_v28 = vmul.f32 %v1930_v27, %v1930_v27 }
0x1263   : > { %v1932_v29 = vsel %vm707_vm6, %v1931_v28, 0.0  ;;  %v2384_v28 = vld [vmem:[%s3398_s14] ss:$0 sm:$0xff] }
0x1264   : > { %1933 = vadd.xlane.f32.xlu0 %v1932_v29 }
0x12f1   : > { %v1934_v44 = vpop.xlane.xlu0 %1933 }
0x12f2   : > { %v1935_v45 = vmul.f32 0.03125, %v1934_v44 }
0x12f4   : > { %v1936_v46 = vadd.f32 1e-05, %v1935_v45 }
0x12f6   : > { %2774 = vrsqrt.f32 %v1936_v46 }
0x1300   : > { %v2775_v48 = vpop.eup %2774 }
0x1301   : > { %v1938_v49 = vmul.f32 %v2775_v48, %v1930_v27 }
0x1303   : > { %v1943_v51 = vmul.f32 %v1942_v47, %v1938_v49 }
0x1305   : > { %v1948_v52 = vadd.f32 %v1947_v50, %v1943_v51 }
0x1307   : > { %2602 = vmatmul.mubr.msk.f32.vlgmr.msra.gmra.mrb[20].mxu1 %vm707_vm6, %v1948_v52 }
0x1308   : > { %2631 = vmatprep.mubr.msk.f32.mxu1 %vm2844_vm3, %v2845_v4  ;;  %v2048_v4 = vrot.slane %v3246_v15, %v1319_v57  ;;  %v2147_v57 = vld [vmem:[%s3397_s13 + $0x8] sm:$0xff] }
0x1309   : > { %v2702_v12 = vpack.c.bf16 %v2147_v57, %v2146_v8 }
0x130b   : > { %2703 = vmatpush3.bf16.msra.mxu1 %v2702_v12 }
0x130c   : > { %2704 = vmatprep.subr.bf16.mxu1 %v2842_v2  ;;  %v2139_v2 = vrot.slane %v3246_v15, %v1411_v19 }
0x130f   : > { %2706 = vmatpush3.bf16.msra.mxu1 %v2705_v16 }
0x13da   : > { %v2031_v55 = vpop.f32.mrb[20].mxu1 }
0x13db   : > { %v2032_v56 = vadd.f32 %v2373_v42, %v2031_v55  ;;  %v2603_v58 = vpop.f32.mrb[21].mxu1 }
0x13dd   : > { %v2035_v59 = vmax.f32 %v2032_v56, 0.0 }
0x13df   : > { %2621 = vmatmul.mubr.msk.f32.vlgmr.msra.gmra.mrb[12].mxu0 %vm1321_vm8, %v2035_v59 }
0x14b2   : > { %v2118_v60 = vpop.f32.mrb[12].mxu0 }
0x14b3   : > { %v2119_v61 = vadd.f32 %v2118_v60, %v2048_v4  ;;  %v2622_v62 = vpop.f32.mrb[13].mxu0 }
0x14b5   : > { %v2122_v63 = vadd.f32 %v2119_v61, %v1948_v52 }
0x14b7   : > { %v2123_v0 = vsel %vm707_vm6, %v2122_v63, 0.0 }
0x14b8   : > { %2124 = vadd.xlane.f32.xlu1 %v2123_v0 }
0x1545   : > { %v2125_v1 = vpop.xlane.xlu1 %2124 }
0x1546   : > { %v2126_v3 = vmul.f32 0.03125, %v2125_v1 }
0x1548   : > { %v2127_v5 = vsub.f32 %v2122_v63, %v2126_v3 }
0x154a   : > { %v2128_v6 = vmul.f32 %v2127_v5, %v2127_v5 }
0x154c   : > { %v2129_v7 = vsel %vm707_vm6, %v2128_v6, 0.0 }
0x154d   : > { %2130 = vadd.xlane.f32.xlu0 %v2129_v7 }
0x15da   : > { %v2131_v17 = vpop.xlane.xlu0 %2130 }
0x15db   : > { %v2132_v18 = vmul.f32 0.03125, %v2131_v17 }
0x15dd   : > { %v2133_v21 = vadd.f32 1e-05, %v2132_v18 }
0x15df   : > { %2776 = vrsqrt.f32 %v2133_v21 }
0x15e9   : > { %v2777_v22 = vpop.eup %2776 }
0x15ea   : > { %v2135_v24 = vmul.f32 %v2777_v22, %v2127_v5 }
0x15ec   : > { %v2140_v26 = vmul.f32 %v2139_v2, %v2135_v24 }
0x15ee   : > { %v2145_v27 = vadd.f32 %v2144_v25, %v2140_v26 }
0x15f0   : > { %2632 = vmatmul.mubr.msk.f32.vlgmr.msra.gmra.mrb[22].mxu1 %vm707_vm6, %v2145_v27 }
0x16c3   : > { %v2226_v19 = vpop.f32.mrb[22].mxu1 }
0x16c4   : > { %v2227_v29 = vadd.f32 %v2384_v28, %v2226_v19  ;;  %v2633_v30 = vpop.f32.mrb[23].mxu1 }
0x16c6   : > { %2230 = vst.msk [vmem:[%s509_s24] sm:$0xff] %vm938_vm7, %v2227_v29 }
0x16c7   : > { %2791 = shalt.err (!%p2788_p3)
}
0x16c8   : > { %s2792_s4 = scalar_lea.hbm %s3341_s17, 128  ;;  %s2796_s24 = scalar_lea.hbm %s3399_s15, 256 }
0x16c9   : > { %p2793_p4 = scmp.ne.s32.totalorder %s3341_s17, %s2792_s4  ;;  %p2797_p9 = scmp.lt.u32.totalorder %s3341_s17, %s3399_s15 }
0x16ca   : > { %p2798_p10 = scmp.lt.u32.totalorder %s2796_s24, %s2792_s4  ;;  %p2800_p12 = scmp.lt.u32.totalorder %s2792_s4, %s3341_s17 }
0x16cb   : > { %p2794_p7 = pnand %p2793_p4, %p2969_p5 }
0x16cc   : > { %p2799_p11 = por %p2798_p10, %p2797_p9 }
0x16cd   : > { %p2795_p8 = pneg %p2794_p7 }
0x16ce   : > { %p2801_p13 = por %p2800_p12, %p2799_p11 }
0x16d0   : > { %p2802_p0 = pnand %p2801_p13, %p2795_p8 }
0x16d2   : > { %2805 = shalt.err (!%p2802_p0)
}
0x16d3   : > { %2707 = dma.vmem_to_hbm [thread:$0]  (%p2969_p5), %s3343_s30, 128, %s3341_s17, %s2232_s16  }
0x16d4 PF: > { %p2713_p1 = scmp.ge.s32.totalorder %s2840_s21, 2  ;;  %s2257_s1 = sand.u32 1, %s2828_s18  }
0x16d5   : > { %s2258_s22 = scalar_lea.sflag [#allocation3], %s2257_s1 }
0x16d6   : > { %p2710_p2 = pnand %p2713_p1, %p2973_p6 }
0x16d8   : > { %2823 = dma.done.wait (!%p2710_p2), %s2258_s22, 128  }
0x16d9   : > { %2825 = vsyncadd (!%p2710_p2), %s2258_s22, 4294967168  ;;  %s3419_s21 = sld [smem:[#allocation6_spill]]  ;;  %s3420_s25 = sld [smem:[#allocation5_spill]] }
0x16da   : > { %s3421_s20 = sld [smem:[#allocation7_spill]]  ;;  %s3422_s18 = smov %s2832_s19 }
0x16df   : > { %p25_p3 = scmp.ge.s32.totalorder %s3419_s21, 4   ;;  %s3423_s19 = smov %s3420_s25 }
0x16e1   :  { %27 = sbr.rel (!%p25_p3) target bundleno = 7 (0x7), region = 128 }
0x16e8   :  { %2263 = vsyncpa [#allocation3], 1 }
0x16e9   :  { %2265 = vsyncpa [#allocation3 + $0x1], 1 }

</bundles_post_ra>
